<compile_context>
chip_gen: v6e
topology: v6e:2x2x1
jax: 0.10.0
libtpu: 0.0.40
codegen_flags: <defaults>
</compile_context>

<pallas_src>
import functools
import math

import jax
import jax.numpy as jnp
from jax.experimental import pallas as pl
from jax.experimental.pallas import tpu as pltpu

# ------------------------- config (small synthetic ViT) ----------------------
PATCH = 16
IMG = 32
C_IN = 3
HIDDEN = 32
NUM_HEADS = 2
HEAD_DIM = HIDDEN // NUM_HEADS
MLP = 64
LAYERS = 2
EPS = 1e-12          # HF ViT layer_norm_eps default
NEG_INF = -1e30      # additive mask value (finite -> no NaN risk in softmax)


# ------------------------------ fused Pallas kernel ---------------------------
def _vit_fused_kernel(patches_ref, patch_w_ref, emb_ref, mask_ref,
                      ln1_g_ref, ln1_b_ref, wqkv_ref, bqkv_ref, wo_ref, bo_ref,
                      ln2_g_ref, ln2_b_ref, w1_ref, b1_ref, w2_ref, b2_ref,
                      lnf_g_ref, lnf_b_ref, pool_w_ref, pool_b_ref, o_ref,
                      *, batch, seq_pad, eps):
    """Entire ViT forward in one kernel; every intermediate stays in vregs/VMEM."""
    f32 = jnp.float32
    bf16 = jnp.bfloat16

    def mm(x, w):
        # Weights are pre-cast bf16 host-side; bf16 MXU operands, f32 accumulation.
        return jnp.dot(x.astype(bf16), w, preferred_element_type=f32)

    def layernorm(x, g, b):
        x = x.astype(f32)
        mu = jnp.mean(x, axis=-1, keepdims=True)
        var = jnp.mean((x - mu) ** 2, axis=-1, keepdims=True)
        return (x - mu) * jax.lax.rsqrt(var + eps) * g + b

    def erf(x):
        # Abramowitz & Stegun 7.1.26 polynomial, |err| < 1.5e-7 (f32-noise level).
        ax = jnp.abs(x)
        t = 1.0 / (1.0 + 0.3275911 * ax)
        poly = ((((1.061405429 * t - 1.453152027) * t + 1.421413741) * t
                 - 0.284496736) * t + 0.254829592) * t
        y = 1.0 - poly * jnp.exp(-ax * ax)
        return jnp.where(x >= 0.0, y, -y)

    def gelu(y):
        # exact erf-GELU (matches HF ViT), not the tanh approximation.
        return 0.5 * y * (1.0 + erf(y * 0.7071067811865476))

    mask = mask_ref[...]                                  # (B*S_pad, B*S_pad) f32

    # ---- patch embedding + CLS/pos/conv-bias in one aligned add ----
    # padded_patches has zero rows at CLS/pad positions; emb already contains
    # cls+pos[0] at row 0, pos[1+p]+conv_bias at patch rows, 0 at pad rows.
    h = mm(patches_ref[...], patch_w_ref[...]) + emb_ref[...]     # (B*S_pad, H) f32

    # ---- pre-LN transformer layers, fully fused (static unroll over 2 layers) ----
    for l in range(LAYERS):
        # --- attention block ---
        x2 = layernorm(h, ln1_g_ref[l], ln1_b_ref[l])
        # fused QKV (1/sqrt(head_dim) already folded into the Q third host-side)
        qkv = mm(x2, wqkv_ref[l]) + bqkv_ref[l]                    # (B*S_pad, 3H)

        heads = []
        for hh in range(NUM_HEADS):                # head split = static lane slice
            q = qkv[:, hh * HEAD_DIM:(hh + 1) * HEAD_DIM].astype(bf16)
            k = qkv[:, HIDDEN + hh * HEAD_DIM:
                    HIDDEN + (hh + 1) * HEAD_DIM].astype(bf16)
            v = qkv[:, 2 * HIDDEN + hh * HEAD_DIM:
                    2 * HIDDEN + (hh + 1) * HEAD_DIM].astype(bf16)
            # ONE score matmul for every batch at once (block-diagonal attention):
            # cross-batch and pad-key columns are killed by the additive mask.
            s = jax.lax.dot_general(q, k, (((1,), (1,)), ((), ())),
                                    preferred_element_type=f32)    # (BS, BS)
            s = s + mask
            s = s - jnp.max(s, axis=-1, keepdims=True)
            p = jnp.exp(s)
            # divide -> EUP reciprocal (free slot when VPU-bound)
            p = p * pl.reciprocal(jnp.sum(p, axis=-1, keepdims=True), approx=True)
            heads.append(jnp.dot(p.astype(bf16), v,
                                 preferred_element_type=f32))      # (BS, HD)
        ctx = jnp.concatenate(heads, axis=-1)                       # (BS, H)

        h = h + mm(ctx, wo_ref[l]) + bo_ref[l]                      # residual

        # --- MLP block ---
        x2 = layernorm(h, ln2_g_ref[l], ln2_b_ref[l])
        m = gelu(mm(x2, w1_ref[l]) + b1_ref[l])
        h = h + mm(m, w2_ref[l]) + b2_ref[l]                        # residual

    # ---- final LayerNorm + pooler = tanh(Linear(h[:, 0])) ----
    h = layernorm(h, lnf_g_ref[...], lnf_b_ref[...])
    # CLS rows sit at the top of each 8-row batch block -> aligned reshape/slice.
    cls_tok = h.reshape(batch, seq_pad, HIDDEN)[:, 0, :]            # (B, H)
    pooled = jnp.tanh(mm(cls_tok, pool_w_ref[...]) + pool_b_ref[...])
    o_ref[...] = pooled.astype(o_ref.dtype)          # only HBM store in the kernel


# --------------------------------- wrapper ------------------------------------
def _full_spec(shape):
    zeros = (0,) * len(shape)
    return pl.BlockSpec(shape, lambda i, _z=zeros: _z)


def visual_encoder_forward(x_nchw, params):
    """x_nchw: (B, C, H, W) float32  ->  pooler_output: (B, HIDDEN)."""
    B, C, Himg, Wimg = x_nchw.shape
    nH, nW = Himg // PATCH, Wimg // PATCH
    num_patches = nH * nW
    S = num_patches + 1
    S_pad = ((S + 7) // 8) * 8                     # pad tokens to a sublane tile
    assert params["emb"].shape == (S_pad, HIDDEN)

    # Conv2d(k=16, s=16) == im2col + matmul; im2col stays in XLA glue (trivial
    # at 32x32).  Inner ordering (C, ph, pw) matches a flattened nn.Conv2d weight.
    # TODO(synk): at ViT-Base scale replace this strided transpose with an
    # Element-indexed Pallas DMA gather that writes patches lane-densely.
    p = x_nchw.reshape(B, C, nH, PATCH, nW, PATCH).transpose(0, 2, 4, 1, 3, 5)
    p = p.reshape(B, num_patches, C * PATCH * PATCH)
    # Rows 0 (CLS) and S..S_pad-1 (pad) are zero, so the patch matmul contributes
    # exactly nothing there; conv bias is folded into the embedding table instead.
    patches = jnp.zeros((B, S_pad, C * PATCH * PATCH), jnp.float32)
    patches = patches.at[:, 1:S, :].set(p)
    patches = patches.reshape(B * S_pad, C * PATCH * PATCH).astype(jnp.bfloat16)

    # Additive embedding table, pre-tiled over the batch (no in-kernel concats).
    emb_add = jnp.tile(params["emb"], (B, 1))                       # (B*S_pad, H)

    # Additive attention mask: block-diagonal over batches, pad keys disabled.
    ids = jnp.arange(B * S_pad)
    same_batch = (ids[:, None] // S_pad) == (ids[None, :] // S_pad)
    key_valid = (ids % S_pad) < S
    mask = jnp.where(same_batch & key_valid[None, :], 0.0, NEG_INF)
    mask = mask.astype(jnp.float32)

    args = (patches, params["patch_w"], emb_add, mask,
            params["ln1_g"], params["ln1_b"], params["wqkv"], params["bqkv"],
            params["wo"], params["bo"], params["ln2_g"], params["ln2_b"],
            params["w1"], params["b1"], params["w2"], params["b2"],
            params["lnf_g"], params["lnf_b"], params["pool_w"], params["pool_b"])

    # TODO(synk): on v7x, shard the batch over both TensorCores with grid=(B,)
    # and dimension_semantics=("parallel",) once B is large enough to matter.
    # TODO(synk): at real ViT-Base scale, stream per-layer bf16 weights
    # (grid axis over layers / pl.Buffered(2)) and set vmem_limit_bytes
    # explicitly instead of keeping all weights resident.
    return pl.pallas_call(
        functools.partial(_vit_fused_kernel, batch=B, seq_pad=S_pad, eps=EPS),
        out_shape=jax.ShapeDtypeStruct((B, HIDDEN), jnp.float32),
        grid=(1,),
        in_specs=[_full_spec(a.shape) for a in args],
        out_specs=_full_spec((B, HIDDEN)),
        compiler_params=pltpu.CompilerParams(
            dimension_semantics=("arbitrary",)),
    )(*args)


# ------------------------------- parameters -----------------------------------
def init_params(key):
    """Random weights, already packed in kernel-ready form:
       bf16 weight matrices, fused+scaled QKV, folded embedding table."""
    def nrm(k, shape):
        return 0.02 * jax.random.normal(k, shape, jnp.float32)

    bf16 = jnp.bfloat16
    num_patches = (IMG // PATCH) ** 2
    S = num_patches + 1
    S_pad = ((S + 7) // 8) * 8
    scale = 1.0 / math.sqrt(HEAD_DIM)

    keys = jax.random.split(key, 8 + LAYERS)
    patch_w = nrm(keys[0], (C_IN * PATCH * PATCH, HIDDEN))
    patch_b = nrm(keys[1], (HIDDEN,))
    cls = nrm(keys[2], (HIDDEN,))
    pos = nrm(keys[3], (S, HIDDEN))

    # Folded additive embedding table (row 0 = cls + pos0; patch rows get the
    # conv bias; pad rows stay zero).
    emb = jnp.zeros((S_pad, HIDDEN), jnp.float32)
    emb = emb.at[0].set(cls + pos[0])
    emb = emb.at[1:S].set(pos[1:] + patch_b)

    params = {
        "patch_w": patch_w.astype(bf16),
        "emb": emb,
        "lnf_g": jnp.ones((1, HIDDEN), jnp.float32),
        "lnf_b": jnp.zeros((1, HIDDEN), jnp.float32),
        "pool_w": nrm(keys[4], (HIDDEN, HIDDEN)).astype(bf16),
        "pool_b": nrm(keys[5], (HIDDEN,)).reshape(1, HIDDEN),
        "ln1_g": jnp.ones((LAYERS, 1, HIDDEN), jnp.float32),
        "ln1_b": jnp.zeros((LAYERS, 1, HIDDEN), jnp.float32),
        "ln2_g": jnp.ones((LAYERS, 1, HIDDEN), jnp.float32),
        "ln2_b": jnp.zeros((LAYERS, 1, HIDDEN), jnp.float32),
    }

    wqkv, bqkv, wo, bo, w1, b1, w2, b2 = [], [], [], [], [], [], [], []
    for l in range(LAYERS):
        lk = jax.random.split(keys[8 + l], 12)
        wq, wk, wv = (nrm(lk[0], (HIDDEN, HIDDEN)), nrm(lk[2], (HIDDEN, HIDDEN)),
                      nrm(lk[4], (HIDDEN, HIDDEN)))
        bq, bk, bv = nrm(lk[1], (HIDDEN,)), nrm(lk[3], (HIDDEN,)), nrm(lk[5], (HIDDEN,))
        # fused QKV with the 1/sqrt(head_dim) scale folded into the Q third
        wqkv.append(jnp.concatenate([wq * scale, wk, wv], axis=1).astype(bf16))
        bqkv.append(jnp.concatenate([bq * scale, bk, bv]).reshape(1, 3 * HIDDEN))
        wo.append(nrm(lk[6], (HIDDEN, HIDDEN)).astype(bf16))
        bo.append(nrm(lk[7], (HIDDEN,)).reshape(1, HIDDEN))
        w1.append(nrm(lk[8], (HIDDEN, MLP)).astype(bf16))
        b1.append(nrm(lk[9], (MLP,)).reshape(1, MLP))
        w2.append(nrm(lk[10], (MLP, HIDDEN)).astype(bf16))
        b2.append(nrm(lk[11], (HIDDEN,)).reshape(1, HIDDEN))
    params.update({
        "wqkv": jnp.stack(wqkv), "bqkv": jnp.stack(bqkv),
        "wo": jnp.stack(wo), "bo": jnp.stack(bo),
        "w1": jnp.stack(w1), "b1": jnp.stack(b1),
        "w2": jnp.stack(w2), "b2": jnp.stack(b2),
    })
    return params


# ----------------------------------- main --------------------------------------
if __name__ == "__main__":
    key = jax.random.PRNGKey(0)
    k_param, k_input = jax.random.split(key)
    params = init_params(k_param)
    x = jax.random.normal(k_input, (2, C_IN, IMG, IMG), jnp.float32)  # NCHW

    out = jax.jit(visual_encoder_forward)(x, params)
    out = jax.block_until_ready(out)

    assert out.shape == (2, HIDDEN), out.shape
    assert out.dtype == jnp.float32
    assert bool(jnp.all(jnp.isfinite(out)))
    print("KERNEL_OK")
</pallas_src>

<mosaic_0001>
module attributes {stable_mosaic.version = 11 : i64} {
  func.func @_vit_fused_kernel(%arg0: i32, %arg1: memref<16x768xbf16, #tpu.memory_space<vmem>>, %arg2: memref<768x32xbf16, #tpu.memory_space<vmem>>, %arg3: memref<16x32xf32, #tpu.memory_space<vmem>>, %arg4: memref<16x16xf32, #tpu.memory_space<vmem>>, %arg5: memref<2x1x32xf32, #tpu.memory_space<vmem>>, %arg6: memref<2x1x32xf32, #tpu.memory_space<vmem>>, %arg7: memref<2x32x96xbf16, #tpu.memory_space<vmem>>, %arg8: memref<2x1x96xf32, #tpu.memory_space<vmem>>, %arg9: memref<2x32x32xbf16, #tpu.memory_space<vmem>>, %arg10: memref<2x1x32xf32, #tpu.memory_space<vmem>>, %arg11: memref<2x1x32xf32, #tpu.memory_space<vmem>>, %arg12: memref<2x1x32xf32, #tpu.memory_space<vmem>>, %arg13: memref<2x32x64xbf16, #tpu.memory_space<vmem>>, %arg14: memref<2x1x64xf32, #tpu.memory_space<vmem>>, %arg15: memref<2x64x32xbf16, #tpu.memory_space<vmem>>, %arg16: memref<2x1x32xf32, #tpu.memory_space<vmem>>, %arg17: memref<1x32xf32, #tpu.memory_space<vmem>>, %arg18: memref<1x32xf32, #tpu.memory_space<vmem>>, %arg19: memref<32x32xbf16, #tpu.memory_space<vmem>>, %arg20: memref<1x32xf32, #tpu.memory_space<vmem>>, %arg21: memref<2x32xf32, #tpu.memory_space<vmem>>) attributes {dimension_semantics = [#tpu.dimension_semantics<arbitrary>], iteration_bounds = array<i64: 1>, scalar_prefetch = 0 : i64, scratch_operands = 0 : i64, tpu.core_type = #tpu.core_type<tc>, window_params = [{pipeline_mode = #tpu.pipeline_mode<synchronous>, transform_indices = @transform_0, window_bounds = array<i64: 16, 768>}, {pipeline_mode = #tpu.pipeline_mode<synchronous>, transform_indices = @transform_1, window_bounds = array<i64: 768, 32>}, {pipeline_mode = #tpu.pipeline_mode<synchronous>, transform_indices = @transform_2, window_bounds = array<i64: 16, 32>}, {pipeline_mode = #tpu.pipeline_mode<synchronous>, transform_indices = @transform_3, window_bounds = array<i64: 16, 16>}, {pipeline_mode = #tpu.pipeline_mode<synchronous>, transform_indices = @transform_4, window_bounds = array<i64: 2, 1, 32>}, {pipeline_mode = #tpu.pipeline_mode<synchronous>, transform_indices = @transform_5, window_bounds = array<i64: 2, 1, 32>}, {pipeline_mode = #tpu.pipeline_mode<synchronous>, transform_indices = @transform_6, window_bounds = array<i64: 2, 32, 96>}, {pipeline_mode = #tpu.pipeline_mode<synchronous>, transform_indices = @transform_7, window_bounds = array<i64: 2, 1, 96>}, {pipeline_mode = #tpu.pipeline_mode<synchronous>, transform_indices = @transform_8, window_bounds = array<i64: 2, 32, 32>}, {pipeline_mode = #tpu.pipeline_mode<synchronous>, transform_indices = @transform_9, window_bounds = array<i64: 2, 1, 32>}, {pipeline_mode = #tpu.pipeline_mode<synchronous>, transform_indices = @transform_10, window_bounds = array<i64: 2, 1, 32>}, {pipeline_mode = #tpu.pipeline_mode<synchronous>, transform_indices = @transform_11, window_bounds = array<i64: 2, 1, 32>}, {pipeline_mode = #tpu.pipeline_mode<synchronous>, transform_indices = @transform_12, window_bounds = array<i64: 2, 32, 64>}, {pipeline_mode = #tpu.pipeline_mode<synchronous>, transform_indices = @transform_13, window_bounds = array<i64: 2, 1, 64>}, {pipeline_mode = #tpu.pipeline_mode<synchronous>, transform_indices = @transform_14, window_bounds = array<i64: 2, 64, 32>}, {pipeline_mode = #tpu.pipeline_mode<synchronous>, transform_indices = @transform_15, window_bounds = array<i64: 2, 1, 32>}, {pipeline_mode = #tpu.pipeline_mode<synchronous>, transform_indices = @transform_16, window_bounds = array<i64: 1, 32>}, {pipeline_mode = #tpu.pipeline_mode<synchronous>, transform_indices = @transform_17, window_bounds = array<i64: 1, 32>}, {pipeline_mode = #tpu.pipeline_mode<synchronous>, transform_indices = @transform_18, window_bounds = array<i64: 32, 32>}, {pipeline_mode = #tpu.pipeline_mode<synchronous>, transform_indices = @transform_19, window_bounds = array<i64: 1, 32>}, {pipeline_mode = #tpu.pipeline_mode<synchronous>, transform_indices = @transform_20, window_bounds = array<i64: 2, 32>}]} {
    %c0 = arith.constant 0 : index
    %c0_0 = arith.constant 0 : index
    %0 = vector.load %arg4[%c0, %c0_0] : memref<16x16xf32, #tpu.memory_space<vmem>>, vector<16x16xf32>
    %c0_1 = arith.constant 0 : index
    %c0_2 = arith.constant 0 : index
    %1 = vector.load %arg1[%c0_1, %c0_2] : memref<16x768xbf16, #tpu.memory_space<vmem>>, vector<16x768xbf16>
    %c0_3 = arith.constant 0 : index
    %c0_4 = arith.constant 0 : index
    %2 = vector.load %arg2[%c0_3, %c0_4] : memref<768x32xbf16, #tpu.memory_space<vmem>>, vector<768x32xbf16>
    %cst = arith.constant dense<0.000000e+00> : vector<16x32xf32>
    %3 = tpu.matmul %1, %2, %cst {dimension_numbers = #tpu.dot_dimension_numbers<[1], [0], [0], [1], [0, 0, 1, 1], [], []>} : vector<16x768xbf16>, vector<768x32xbf16>, vector<16x32xf32> -> vector<16x32xf32>
    %c0_5 = arith.constant 0 : index
    %c0_6 = arith.constant 0 : index
    %4 = vector.load %arg3[%c0_5, %c0_6] : memref<16x32xf32, #tpu.memory_space<vmem>>, vector<16x32xf32>
    %5 = arith.addf %3, %4 : vector<16x32xf32>
    %c0_7 = arith.constant 0 : index
    %c0_8 = arith.constant 0 : index
    %c0_9 = arith.constant 0 : index
    %6 = vector.load %arg5[%c0_7, %c0_8, %c0_9] : memref<2x1x32xf32, #tpu.memory_space<vmem>>, vector<1x1x32xf32>
    %7 = vector.shape_cast %6 : vector<1x1x32xf32> to vector<1x32xf32>
    %c0_10 = arith.constant 0 : index
    %c0_11 = arith.constant 0 : index
    %c0_12 = arith.constant 0 : index
    %8 = vector.load %arg6[%c0_10, %c0_11, %c0_12] : memref<2x1x32xf32, #tpu.memory_space<vmem>>, vector<1x1x32xf32>
    %9 = vector.shape_cast %8 : vector<1x1x32xf32> to vector<1x32xf32>
    %cst_13 = arith.constant dense<0.000000e+00> : vector<16xf32>
    %10 = vector.multi_reduction <add>, %5, %cst_13 [1] : vector<16x32xf32> to vector<16xf32>
    %11 = vector.shape_cast %10 : vector<16xf32> to vector<16x1xf32>
    %cst_14 = arith.constant 3.200000e+01 : f32
    %12 = vector.broadcast %cst_14 : f32 to vector<16x1xf32>
    %13 = arith.divf %11, %12 : vector<16x1xf32>
    %14 = vector.broadcast %13 : vector<16x1xf32> to vector<16x32xf32>
    %15 = arith.subf %5, %14 : vector<16x32xf32>
    %16 = arith.mulf %15, %15 : vector<16x32xf32>
    %cst_15 = arith.constant dense<0.000000e+00> : vector<16xf32>
    %17 = vector.multi_reduction <add>, %16, %cst_15 [1] : vector<16x32xf32> to vector<16xf32>
    %18 = vector.shape_cast %17 : vector<16xf32> to vector<16x1xf32>
    %cst_16 = arith.constant 3.200000e+01 : f32
    %19 = vector.broadcast %cst_16 : f32 to vector<16x1xf32>
    %20 = arith.divf %18, %19 : vector<16x1xf32>
    %21 = vector.broadcast %13 : vector<16x1xf32> to vector<16x32xf32>
    %22 = arith.subf %5, %21 : vector<16x32xf32>
    %cst_17 = arith.constant 9.99999996E-13 : f32
    %23 = vector.broadcast %cst_17 : f32 to vector<16x1xf32>
    %24 = arith.addf %20, %23 : vector<16x1xf32>
    %25 = math.rsqrt %24 : vector<16x1xf32>
    %26 = vector.broadcast %25 : vector<16x1xf32> to vector<16x32xf32>
    %27 = arith.mulf %22, %26 : vector<16x32xf32>
    %28 = vector.broadcast %7 : vector<1x32xf32> to vector<16x32xf32>
    %29 = arith.mulf %27, %28 : vector<16x32xf32>
    %30 = vector.broadcast %9 : vector<1x32xf32> to vector<16x32xf32>
    %31 = arith.addf %29, %30 : vector<16x32xf32>
    %c0_18 = arith.constant 0 : index
    %c0_19 = arith.constant 0 : index
    %c0_20 = arith.constant 0 : index
    %32 = vector.load %arg7[%c0_18, %c0_19, %c0_20] : memref<2x32x96xbf16, #tpu.memory_space<vmem>>, vector<1x32x96xbf16>
    %33 = vector.shape_cast %32 : vector<1x32x96xbf16> to vector<32x96xbf16>
    %34 = arith.truncf %31 : vector<16x32xf32> to vector<16x32xbf16>
    %cst_21 = arith.constant dense<0.000000e+00> : vector<16x96xf32>
    %35 = tpu.matmul %34, %33, %cst_21 {dimension_numbers = #tpu.dot_dimension_numbers<[1], [0], [0], [1], [0, 0, 1, 1], [], []>} : vector<16x32xbf16>, vector<32x96xbf16>, vector<16x96xf32> -> vector<16x96xf32>
    %c0_22 = arith.constant 0 : index
    %c0_23 = arith.constant 0 : index
    %c0_24 = arith.constant 0 : index
    %36 = vector.load %arg8[%c0_22, %c0_23, %c0_24] : memref<2x1x96xf32, #tpu.memory_space<vmem>>, vector<1x1x96xf32>
    %37 = vector.shape_cast %36 : vector<1x1x96xf32> to vector<1x96xf32>
    %38 = vector.broadcast %37 : vector<1x96xf32> to vector<16x96xf32>
    %39 = arith.addf %35, %38 : vector<16x96xf32>
    %40 = vector.extract_strided_slice %39 {offsets = [0, 0], sizes = [16, 16], strides = [1, 1]} : vector<16x96xf32> to vector<16x16xf32>
    %41 = arith.truncf %40 : vector<16x16xf32> to vector<16x16xbf16>
    %42 = vector.extract_strided_slice %39 {offsets = [0, 32], sizes = [16, 16], strides = [1, 1]} : vector<16x96xf32> to vector<16x16xf32>
    %43 = arith.truncf %42 : vector<16x16xf32> to vector<16x16xbf16>
    %44 = vector.extract_strided_slice %39 {offsets = [0, 64], sizes = [16, 16], strides = [1, 1]} : vector<16x96xf32> to vector<16x16xf32>
    %45 = arith.truncf %44 : vector<16x16xf32> to vector<16x16xbf16>
    %cst_25 = arith.constant dense<0.000000e+00> : vector<16x16xf32>
    %46 = tpu.matmul %41, %43, %cst_25 {dimension_numbers = #tpu.dot_dimension_numbers<[1], [1], [0], [0], [0, 0, 1, 0], [], []>} : vector<16x16xbf16>, vector<16x16xbf16>, vector<16x16xf32> -> vector<16x16xf32>
    %47 = arith.addf %46, %0 : vector<16x16xf32>
    %cst_26 = arith.constant dense<0xFF800000> : vector<16xf32>
    %48 = vector.multi_reduction <maximumf>, %47, %cst_26 [1] : vector<16x16xf32> to vector<16xf32>
    %49 = vector.shape_cast %48 : vector<16xf32> to vector<16x1xf32>
    %50 = vector.broadcast %49 : vector<16x1xf32> to vector<16x16xf32>
    %51 = arith.subf %47, %50 : vector<16x16xf32>
    %52 = math.exp %51 : vector<16x16xf32>
    %cst_27 = arith.constant dense<0.000000e+00> : vector<16xf32>
    %53 = vector.multi_reduction <add>, %52, %cst_27 [1] : vector<16x16xf32> to vector<16xf32>
    %54 = vector.shape_cast %53 : vector<16xf32> to vector<16x1xf32>
    %55 = tpu.reciprocal %54 {approx = true} : vector<16x1xf32> -> vector<16x1xf32>
    %56 = vector.broadcast %55 : vector<16x1xf32> to vector<16x16xf32>
    %57 = arith.mulf %52, %56 : vector<16x16xf32>
    %58 = arith.truncf %57 : vector<16x16xf32> to vector<16x16xbf16>
    %cst_28 = arith.constant dense<0.000000e+00> : vector<16x16xf32>
    %59 = tpu.matmul %58, %45, %cst_28 {dimension_numbers = #tpu.dot_dimension_numbers<[1], [0], [0], [1], [0, 0, 1, 1], [], []>} : vector<16x16xbf16>, vector<16x16xbf16>, vector<16x16xf32> -> vector<16x16xf32>
    %60 = vector.extract_strided_slice %39 {offsets = [0, 16], sizes = [16, 16], strides = [1, 1]} : vector<16x96xf32> to vector<16x16xf32>
    %61 = arith.truncf %60 : vector<16x16xf32> to vector<16x16xbf16>
    %62 = vector.extract_strided_slice %39 {offsets = [0, 48], sizes = [16, 16], strides = [1, 1]} : vector<16x96xf32> to vector<16x16xf32>
    %63 = arith.truncf %62 : vector<16x16xf32> to vector<16x16xbf16>
    %64 = vector.extract_strided_slice %39 {offsets = [0, 80], sizes = [16, 16], strides = [1, 1]} : vector<16x96xf32> to vector<16x16xf32>
    %65 = arith.truncf %64 : vector<16x16xf32> to vector<16x16xbf16>
    %cst_29 = arith.constant dense<0.000000e+00> : vector<16x16xf32>
    %66 = tpu.matmul %61, %63, %cst_29 {dimension_numbers = #tpu.dot_dimension_numbers<[1], [1], [0], [0], [0, 0, 1, 0], [], []>} : vector<16x16xbf16>, vector<16x16xbf16>, vector<16x16xf32> -> vector<16x16xf32>
    %67 = arith.addf %66, %0 : vector<16x16xf32>
    %cst_30 = arith.constant dense<0xFF800000> : vector<16xf32>
    %68 = vector.multi_reduction <maximumf>, %67, %cst_30 [1] : vector<16x16xf32> to vector<16xf32>
    %69 = vector.shape_cast %68 : vector<16xf32> to vector<16x1xf32>
    %70 = vector.broadcast %69 : vector<16x1xf32> to vector<16x16xf32>
    %71 = arith.subf %67, %70 : vector<16x16xf32>
    %72 = math.exp %71 : vector<16x16xf32>
    %cst_31 = arith.constant dense<0.000000e+00> : vector<16xf32>
    %73 = vector.multi_reduction <add>, %72, %cst_31 [1] : vector<16x16xf32> to vector<16xf32>
    %74 = vector.shape_cast %73 : vector<16xf32> to vector<16x1xf32>
    %75 = tpu.reciprocal %74 {approx = true} : vector<16x1xf32> -> vector<16x1xf32>
    %76 = vector.broadcast %75 : vector<16x1xf32> to vector<16x16xf32>
    %77 = arith.mulf %72, %76 : vector<16x16xf32>
    %78 = arith.truncf %77 : vector<16x16xf32> to vector<16x16xbf16>
    %cst_32 = arith.constant dense<0.000000e+00> : vector<16x16xf32>
    %79 = tpu.matmul %78, %65, %cst_32 {dimension_numbers = #tpu.dot_dimension_numbers<[1], [0], [0], [1], [0, 0, 1, 1], [], []>} : vector<16x16xbf16>, vector<16x16xbf16>, vector<16x16xf32> -> vector<16x16xf32>
    %80 = tpu.concatenate %59, %79 in 1 : vector<16x16xf32>, vector<16x16xf32> -> vector<16x32xf32>
    %c0_33 = arith.constant 0 : index
    %c0_34 = arith.constant 0 : index
    %c0_35 = arith.constant 0 : index
    %81 = vector.load %arg9[%c0_33, %c0_34, %c0_35] : memref<2x32x32xbf16, #tpu.memory_space<vmem>>, vector<1x32x32xbf16>
    %82 = vector.shape_cast %81 : vector<1x32x32xbf16> to vector<32x32xbf16>
    %83 = arith.truncf %80 : vector<16x32xf32> to vector<16x32xbf16>
    %cst_36 = arith.constant dense<0.000000e+00> : vector<16x32xf32>
    %84 = tpu.matmul %83, %82, %cst_36 {dimension_numbers = #tpu.dot_dimension_numbers<[1], [0], [0], [1], [0, 0, 1, 1], [], []>} : vector<16x32xbf16>, vector<32x32xbf16>, vector<16x32xf32> -> vector<16x32xf32>
    %85 = arith.addf %5, %84 : vector<16x32xf32>
    %c0_37 = arith.constant 0 : index
    %c0_38 = arith.constant 0 : index
    %c0_39 = arith.constant 0 : index
    %86 = vector.load %arg10[%c0_37, %c0_38, %c0_39] : memref<2x1x32xf32, #tpu.memory_space<vmem>>, vector<1x1x32xf32>
    %87 = vector.shape_cast %86 : vector<1x1x32xf32> to vector<1x32xf32>
    %88 = vector.broadcast %87 : vector<1x32xf32> to vector<16x32xf32>
    %89 = arith.addf %85, %88 : vector<16x32xf32>
    %c0_40 = arith.constant 0 : index
    %c0_41 = arith.constant 0 : index
    %c0_42 = arith.constant 0 : index
    %90 = vector.load %arg11[%c0_40, %c0_41, %c0_42] : memref<2x1x32xf32, #tpu.memory_space<vmem>>, vector<1x1x32xf32>
    %91 = vector.shape_cast %90 : vector<1x1x32xf32> to vector<1x32xf32>
    %c0_43 = arith.constant 0 : index
    %c0_44 = arith.constant 0 : index
    %c0_45 = arith.constant 0 : index
    %92 = vector.load %arg12[%c0_43, %c0_44, %c0_45] : memref<2x1x32xf32, #tpu.memory_space<vmem>>, vector<1x1x32xf32>
    %93 = vector.shape_cast %92 : vector<1x1x32xf32> to vector<1x32xf32>
    %cst_46 = arith.constant dense<0.000000e+00> : vector<16xf32>
    %94 = vector.multi_reduction <add>, %89, %cst_46 [1] : vector<16x32xf32> to vector<16xf32>
    %95 = vector.shape_cast %94 : vector<16xf32> to vector<16x1xf32>
    %cst_47 = arith.constant 3.200000e+01 : f32
    %96 = vector.broadcast %cst_47 : f32 to vector<16x1xf32>
    %97 = arith.divf %95, %96 : vector<16x1xf32>
    %98 = vector.broadcast %97 : vector<16x1xf32> to vector<16x32xf32>
    %99 = arith.subf %89, %98 : vector<16x32xf32>
    %100 = arith.mulf %99, %99 : vector<16x32xf32>
    %cst_48 = arith.constant dense<0.000000e+00> : vector<16xf32>
    %101 = vector.multi_reduction <add>, %100, %cst_48 [1] : vector<16x32xf32> to vector<16xf32>
    %102 = vector.shape_cast %101 : vector<16xf32> to vector<16x1xf32>
    %cst_49 = arith.constant 3.200000e+01 : f32
    %103 = vector.broadcast %cst_49 : f32 to vector<16x1xf32>
    %104 = arith.divf %102, %103 : vector<16x1xf32>
    %105 = vector.broadcast %97 : vector<16x1xf32> to vector<16x32xf32>
    %106 = arith.subf %89, %105 : vector<16x32xf32>
    %cst_50 = arith.constant 9.99999996E-13 : f32
    %107 = vector.broadcast %cst_50 : f32 to vector<16x1xf32>
    %108 = arith.addf %104, %107 : vector<16x1xf32>
    %109 = math.rsqrt %108 : vector<16x1xf32>
    %110 = vector.broadcast %109 : vector<16x1xf32> to vector<16x32xf32>
    %111 = arith.mulf %106, %110 : vector<16x32xf32>
    %112 = vector.broadcast %91 : vector<1x32xf32> to vector<16x32xf32>
    %113 = arith.mulf %111, %112 : vector<16x32xf32>
    %114 = vector.broadcast %93 : vector<1x32xf32> to vector<16x32xf32>
    %115 = arith.addf %113, %114 : vector<16x32xf32>
    %c0_51 = arith.constant 0 : index
    %c0_52 = arith.constant 0 : index
    %c0_53 = arith.constant 0 : index
    %116 = vector.load %arg13[%c0_51, %c0_52, %c0_53] : memref<2x32x64xbf16, #tpu.memory_space<vmem>>, vector<1x32x64xbf16>
    %117 = vector.shape_cast %116 : vector<1x32x64xbf16> to vector<32x64xbf16>
    %118 = arith.truncf %115 : vector<16x32xf32> to vector<16x32xbf16>
    %cst_54 = arith.constant dense<0.000000e+00> : vector<16x64xf32>
    %119 = tpu.matmul %118, %117, %cst_54 {dimension_numbers = #tpu.dot_dimension_numbers<[1], [0], [0], [1], [0, 0, 1, 1], [], []>} : vector<16x32xbf16>, vector<32x64xbf16>, vector<16x64xf32> -> vector<16x64xf32>
    %c0_55 = arith.constant 0 : index
    %c0_56 = arith.constant 0 : index
    %c0_57 = arith.constant 0 : index
    %120 = vector.load %arg14[%c0_55, %c0_56, %c0_57] : memref<2x1x64xf32, #tpu.memory_space<vmem>>, vector<1x1x64xf32>
    %121 = vector.shape_cast %120 : vector<1x1x64xf32> to vector<1x64xf32>
    %122 = vector.broadcast %121 : vector<1x64xf32> to vector<16x64xf32>
    %123 = arith.addf %119, %122 : vector<16x64xf32>
    %cst_58 = arith.constant 5.000000e-01 : f32
    %124 = vector.broadcast %cst_58 : f32 to vector<16x64xf32>
    %125 = arith.mulf %124, %123 : vector<16x64xf32>
    %cst_59 = arith.constant 0.707106769 : f32
    %126 = vector.broadcast %cst_59 : f32 to vector<16x64xf32>
    %127 = arith.mulf %123, %126 : vector<16x64xf32>
    %128 = math.absf %127 : vector<16x64xf32>
    %cst_60 = arith.constant 0.327591091 : f32
    %129 = vector.broadcast %cst_60 : f32 to vector<16x64xf32>
    %130 = arith.mulf %129, %128 : vector<16x64xf32>
    %cst_61 = arith.constant 1.000000e+00 : f32
    %131 = vector.broadcast %cst_61 : f32 to vector<16x64xf32>
    %132 = arith.addf %131, %130 : vector<16x64xf32>
    %cst_62 = arith.constant 1.000000e+00 : f32
    %133 = vector.broadcast %cst_62 : f32 to vector<16x64xf32>
    %134 = arith.divf %133, %132 : vector<16x64xf32>
    %cst_63 = arith.constant 1.06140542 : f32
    %135 = vector.broadcast %cst_63 : f32 to vector<16x64xf32>
    %136 = arith.mulf %135, %134 : vector<16x64xf32>
    %cst_64 = arith.constant 1.45315206 : f32
    %137 = vector.broadcast %cst_64 : f32 to vector<16x64xf32>
    %138 = arith.subf %136, %137 : vector<16x64xf32>
    %139 = arith.mulf %138, %134 : vector<16x64xf32>
    %cst_65 = arith.constant 1.42141378 : f32
    %140 = vector.broadcast %cst_65 : f32 to vector<16x64xf32>
    %141 = arith.addf %139, %140 : vector<16x64xf32>
    %142 = arith.mulf %141, %134 : vector<16x64xf32>
    %cst_66 = arith.constant 0.284496725 : f32
    %143 = vector.broadcast %cst_66 : f32 to vector<16x64xf32>
    %144 = arith.subf %142, %143 : vector<16x64xf32>
    %145 = arith.mulf %144, %134 : vector<16x64xf32>
    %cst_67 = arith.constant 0.254829586 : f32
    %146 = vector.broadcast %cst_67 : f32 to vector<16x64xf32>
    %147 = arith.addf %145, %146 : vector<16x64xf32>
    %148 = arith.mulf %147, %134 : vector<16x64xf32>
    %cst_68 = arith.constant 0.000000e+00 : f32
    %149 = vector.broadcast %cst_68 : f32 to vector<16x64xf32>
    %150 = arith.subf %149, %128 : vector<16x64xf32>
    %151 = arith.mulf %150, %128 : vector<16x64xf32>
    %152 = math.exp %151 : vector<16x64xf32>
    %153 = arith.mulf %148, %152 : vector<16x64xf32>
    %cst_69 = arith.constant 1.000000e+00 : f32
    %154 = vector.broadcast %cst_69 : f32 to vector<16x64xf32>
    %155 = arith.subf %154, %153 : vector<16x64xf32>
    %cst_70 = arith.constant 0.000000e+00 : f32
    %156 = vector.broadcast %cst_70 : f32 to vector<16x64xf32>
    %157 = arith.cmpf oge, %127, %156 : vector<16x64xf32>
    %cst_71 = arith.constant 0.000000e+00 : f32
    %158 = vector.broadcast %cst_71 : f32 to vector<16x64xf32>
    %159 = arith.subf %158, %155 : vector<16x64xf32>
    %160 = arith.select %157, %155, %159 : vector<16x64xi1>, vector<16x64xf32>
    %cst_72 = arith.constant 1.000000e+00 : f32
    %161 = vector.broadcast %cst_72 : f32 to vector<16x64xf32>
    %162 = arith.addf %161, %160 : vector<16x64xf32>
    %163 = arith.mulf %125, %162 : vector<16x64xf32>
    %c0_73 = arith.constant 0 : index
    %c0_74 = arith.constant 0 : index
    %c0_75 = arith.constant 0 : index
    %164 = vector.load %arg15[%c0_73, %c0_74, %c0_75] : memref<2x64x32xbf16, #tpu.memory_space<vmem>>, vector<1x64x32xbf16>
    %165 = vector.shape_cast %164 : vector<1x64x32xbf16> to vector<64x32xbf16>
    %166 = arith.truncf %163 : vector<16x64xf32> to vector<16x64xbf16>
    %cst_76 = arith.constant dense<0.000000e+00> : vector<16x32xf32>
    %167 = tpu.matmul %166, %165, %cst_76 {dimension_numbers = #tpu.dot_dimension_numbers<[1], [0], [0], [1], [0, 0, 1, 1], [], []>} : vector<16x64xbf16>, vector<64x32xbf16>, vector<16x32xf32> -> vector<16x32xf32>
    %168 = arith.addf %89, %167 : vector<16x32xf32>
    %c0_77 = arith.constant 0 : index
    %c0_78 = arith.constant 0 : index
    %c0_79 = arith.constant 0 : index
    %169 = vector.load %arg16[%c0_77, %c0_78, %c0_79] : memref<2x1x32xf32, #tpu.memory_space<vmem>>, vector<1x1x32xf32>
    %170 = vector.shape_cast %169 : vector<1x1x32xf32> to vector<1x32xf32>
    %171 = vector.broadcast %170 : vector<1x32xf32> to vector<16x32xf32>
    %172 = arith.addf %168, %171 : vector<16x32xf32>
    %c1 = arith.constant 1 : index
    %c0_80 = arith.constant 0 : index
    %c0_81 = arith.constant 0 : index
    %173 = vector.load %arg5[%c1, %c0_80, %c0_81] : memref<2x1x32xf32, #tpu.memory_space<vmem>>, vector<1x1x32xf32>
    %174 = vector.shape_cast %173 : vector<1x1x32xf32> to vector<1x32xf32>
    %c1_82 = arith.constant 1 : index
    %c0_83 = arith.constant 0 : index
    %c0_84 = arith.constant 0 : index
    %175 = vector.load %arg6[%c1_82, %c0_83, %c0_84] : memref<2x1x32xf32, #tpu.memory_space<vmem>>, vector<1x1x32xf32>
    %176 = vector.shape_cast %175 : vector<1x1x32xf32> to vector<1x32xf32>
    %cst_85 = arith.constant dense<0.000000e+00> : vector<16xf32>
    %177 = vector.multi_reduction <add>, %172, %cst_85 [1] : vector<16x32xf32> to vector<16xf32>
    %178 = vector.shape_cast %177 : vector<16xf32> to vector<16x1xf32>
    %cst_86 = arith.constant 3.200000e+01 : f32
    %179 = vector.broadcast %cst_86 : f32 to vector<16x1xf32>
    %180 = arith.divf %178, %179 : vector<16x1xf32>
    %181 = vector.broadcast %180 : vector<16x1xf32> to vector<16x32xf32>
    %182 = arith.subf %172, %181 : vector<16x32xf32>
    %183 = arith.mulf %182, %182 : vector<16x32xf32>
    %cst_87 = arith.constant dense<0.000000e+00> : vector<16xf32>
    %184 = vector.multi_reduction <add>, %183, %cst_87 [1] : vector<16x32xf32> to vector<16xf32>
    %185 = vector.shape_cast %184 : vector<16xf32> to vector<16x1xf32>
    %cst_88 = arith.constant 3.200000e+01 : f32
    %186 = vector.broadcast %cst_88 : f32 to vector<16x1xf32>
    %187 = arith.divf %185, %186 : vector<16x1xf32>
    %188 = vector.broadcast %180 : vector<16x1xf32> to vector<16x32xf32>
    %189 = arith.subf %172, %188 : vector<16x32xf32>
    %cst_89 = arith.constant 9.99999996E-13 : f32
    %190 = vector.broadcast %cst_89 : f32 to vector<16x1xf32>
    %191 = arith.addf %187, %190 : vector<16x1xf32>
    %192 = math.rsqrt %191 : vector<16x1xf32>
    %193 = vector.broadcast %192 : vector<16x1xf32> to vector<16x32xf32>
    %194 = arith.mulf %189, %193 : vector<16x32xf32>
    %195 = vector.broadcast %174 : vector<1x32xf32> to vector<16x32xf32>
    %196 = arith.mulf %194, %195 : vector<16x32xf32>
    %197 = vector.broadcast %176 : vector<1x32xf32> to vector<16x32xf32>
    %198 = arith.addf %196, %197 : vector<16x32xf32>
    %c1_90 = arith.constant 1 : index
    %c0_91 = arith.constant 0 : index
    %c0_92 = arith.constant 0 : index
    %199 = vector.load %arg7[%c1_90, %c0_91, %c0_92] : memref<2x32x96xbf16, #tpu.memory_space<vmem>>, vector<1x32x96xbf16>
    %200 = vector.shape_cast %199 : vector<1x32x96xbf16> to vector<32x96xbf16>
    %201 = arith.truncf %198 : vector<16x32xf32> to vector<16x32xbf16>
    %cst_93 = arith.constant dense<0.000000e+00> : vector<16x96xf32>
    %202 = tpu.matmul %201, %200, %cst_93 {dimension_numbers = #tpu.dot_dimension_numbers<[1], [0], [0], [1], [0, 0, 1, 1], [], []>} : vector<16x32xbf16>, vector<32x96xbf16>, vector<16x96xf32> -> vector<16x96xf32>
    %c1_94 = arith.constant 1 : index
    %c0_95 = arith.constant 0 : index
    %c0_96 = arith.constant 0 : index
    %203 = vector.load %arg8[%c1_94, %c0_95, %c0_96] : memref<2x1x96xf32, #tpu.memory_space<vmem>>, vector<1x1x96xf32>
    %204 = vector.shape_cast %203 : vector<1x1x96xf32> to vector<1x96xf32>
    %205 = vector.broadcast %204 : vector<1x96xf32> to vector<16x96xf32>
    %206 = arith.addf %202, %205 : vector<16x96xf32>
    %207 = vector.extract_strided_slice %206 {offsets = [0, 0], sizes = [16, 16], strides = [1, 1]} : vector<16x96xf32> to vector<16x16xf32>
    %208 = arith.truncf %207 : vector<16x16xf32> to vector<16x16xbf16>
    %209 = vector.extract_strided_slice %206 {offsets = [0, 32], sizes = [16, 16], strides = [1, 1]} : vector<16x96xf32> to vector<16x16xf32>
    %210 = arith.truncf %209 : vector<16x16xf32> to vector<16x16xbf16>
    %211 = vector.extract_strided_slice %206 {offsets = [0, 64], sizes = [16, 16], strides = [1, 1]} : vector<16x96xf32> to vector<16x16xf32>
    %212 = arith.truncf %211 : vector<16x16xf32> to vector<16x16xbf16>
    %cst_97 = arith.constant dense<0.000000e+00> : vector<16x16xf32>
    %213 = tpu.matmul %208, %210, %cst_97 {dimension_numbers = #tpu.dot_dimension_numbers<[1], [1], [0], [0], [0, 0, 1, 0], [], []>} : vector<16x16xbf16>, vector<16x16xbf16>, vector<16x16xf32> -> vector<16x16xf32>
    %214 = arith.addf %213, %0 : vector<16x16xf32>
    %cst_98 = arith.constant dense<0xFF800000> : vector<16xf32>
    %215 = vector.multi_reduction <maximumf>, %214, %cst_98 [1] : vector<16x16xf32> to vector<16xf32>
    %216 = vector.shape_cast %215 : vector<16xf32> to vector<16x1xf32>
    %217 = vector.broadcast %216 : vector<16x1xf32> to vector<16x16xf32>
    %218 = arith.subf %214, %217 : vector<16x16xf32>
    %219 = math.exp %218 : vector<16x16xf32>
    %cst_99 = arith.constant dense<0.000000e+00> : vector<16xf32>
    %220 = vector.multi_reduction <add>, %219, %cst_99 [1] : vector<16x16xf32> to vector<16xf32>
    %221 = vector.shape_cast %220 : vector<16xf32> to vector<16x1xf32>
    %222 = tpu.reciprocal %221 {approx = true} : vector<16x1xf32> -> vector<16x1xf32>
    %223 = vector.broadcast %222 : vector<16x1xf32> to vector<16x16xf32>
    %224 = arith.mulf %219, %223 : vector<16x16xf32>
    %225 = arith.truncf %224 : vector<16x16xf32> to vector<16x16xbf16>
    %cst_100 = arith.constant dense<0.000000e+00> : vector<16x16xf32>
    %226 = tpu.matmul %225, %212, %cst_100 {dimension_numbers = #tpu.dot_dimension_numbers<[1], [0], [0], [1], [0, 0, 1, 1], [], []>} : vector<16x16xbf16>, vector<16x16xbf16>, vector<16x16xf32> -> vector<16x16xf32>
    %227 = vector.extract_strided_slice %206 {offsets = [0, 16], sizes = [16, 16], strides = [1, 1]} : vector<16x96xf32> to vector<16x16xf32>
    %228 = arith.truncf %227 : vector<16x16xf32> to vector<16x16xbf16>
    %229 = vector.extract_strided_slice %206 {offsets = [0, 48], sizes = [16, 16], strides = [1, 1]} : vector<16x96xf32> to vector<16x16xf32>
    %230 = arith.truncf %229 : vector<16x16xf32> to vector<16x16xbf16>
    %231 = vector.extract_strided_slice %206 {offsets = [0, 80], sizes = [16, 16], strides = [1, 1]} : vector<16x96xf32> to vector<16x16xf32>
    %232 = arith.truncf %231 : vector<16x16xf32> to vector<16x16xbf16>
    %cst_101 = arith.constant dense<0.000000e+00> : vector<16x16xf32>
    %233 = tpu.matmul %228, %230, %cst_101 {dimension_numbers = #tpu.dot_dimension_numbers<[1], [1], [0], [0], [0, 0, 1, 0], [], []>} : vector<16x16xbf16>, vector<16x16xbf16>, vector<16x16xf32> -> vector<16x16xf32>
    %234 = arith.addf %233, %0 : vector<16x16xf32>
    %cst_102 = arith.constant dense<0xFF800000> : vector<16xf32>
    %235 = vector.multi_reduction <maximumf>, %234, %cst_102 [1] : vector<16x16xf32> to vector<16xf32>
    %236 = vector.shape_cast %235 : vector<16xf32> to vector<16x1xf32>
    %237 = vector.broadcast %236 : vector<16x1xf32> to vector<16x16xf32>
    %238 = arith.subf %234, %237 : vector<16x16xf32>
    %239 = math.exp %238 : vector<16x16xf32>
    %cst_103 = arith.constant dense<0.000000e+00> : vector<16xf32>
    %240 = vector.multi_reduction <add>, %239, %cst_103 [1] : vector<16x16xf32> to vector<16xf32>
    %241 = vector.shape_cast %240 : vector<16xf32> to vector<16x1xf32>
    %242 = tpu.reciprocal %241 {approx = true} : vector<16x1xf32> -> vector<16x1xf32>
    %243 = vector.broadcast %242 : vector<16x1xf32> to vector<16x16xf32>
    %244 = arith.mulf %239, %243 : vector<16x16xf32>
    %245 = arith.truncf %244 : vector<16x16xf32> to vector<16x16xbf16>
    %cst_104 = arith.constant dense<0.000000e+00> : vector<16x16xf32>
    %246 = tpu.matmul %245, %232, %cst_104 {dimension_numbers = #tpu.dot_dimension_numbers<[1], [0], [0], [1], [0, 0, 1, 1], [], []>} : vector<16x16xbf16>, vector<16x16xbf16>, vector<16x16xf32> -> vector<16x16xf32>
    %247 = tpu.concatenate %226, %246 in 1 : vector<16x16xf32>, vector<16x16xf32> -> vector<16x32xf32>
    %c1_105 = arith.constant 1 : index
    %c0_106 = arith.constant 0 : index
    %c0_107 = arith.constant 0 : index
    %248 = vector.load %arg9[%c1_105, %c0_106, %c0_107] : memref<2x32x32xbf16, #tpu.memory_space<vmem>>, vector<1x32x32xbf16>
    %249 = vector.shape_cast %248 : vector<1x32x32xbf16> to vector<32x32xbf16>
    %250 = arith.truncf %247 : vector<16x32xf32> to vector<16x32xbf16>
    %cst_108 = arith.constant dense<0.000000e+00> : vector<16x32xf32>
    %251 = tpu.matmul %250, %249, %cst_108 {dimension_numbers = #tpu.dot_dimension_numbers<[1], [0], [0], [1], [0, 0, 1, 1], [], []>} : vector<16x32xbf16>, vector<32x32xbf16>, vector<16x32xf32> -> vector<16x32xf32>
    %252 = arith.addf %172, %251 : vector<16x32xf32>
    %c1_109 = arith.constant 1 : index
    %c0_110 = arith.constant 0 : index
    %c0_111 = arith.constant 0 : index
    %253 = vector.load %arg10[%c1_109, %c0_110, %c0_111] : memref<2x1x32xf32, #tpu.memory_space<vmem>>, vector<1x1x32xf32>
    %254 = vector.shape_cast %253 : vector<1x1x32xf32> to vector<1x32xf32>
    %255 = vector.broadcast %254 : vector<1x32xf32> to vector<16x32xf32>
    %256 = arith.addf %252, %255 : vector<16x32xf32>
    %c1_112 = arith.constant 1 : index
    %c0_113 = arith.constant 0 : index
    %c0_114 = arith.constant 0 : index
    %257 = vector.load %arg11[%c1_112, %c0_113, %c0_114] : memref<2x1x32xf32, #tpu.memory_space<vmem>>, vector<1x1x32xf32>
    %258 = vector.shape_cast %257 : vector<1x1x32xf32> to vector<1x32xf32>
    %c1_115 = arith.constant 1 : index
    %c0_116 = arith.constant 0 : index
    %c0_117 = arith.constant 0 : index
    %259 = vector.load %arg12[%c1_115, %c0_116, %c0_117] : memref<2x1x32xf32, #tpu.memory_space<vmem>>, vector<1x1x32xf32>
    %260 = vector.shape_cast %259 : vector<1x1x32xf32> to vector<1x32xf32>
    %cst_118 = arith.constant dense<0.000000e+00> : vector<16xf32>
    %261 = vector.multi_reduction <add>, %256, %cst_118 [1] : vector<16x32xf32> to vector<16xf32>
    %262 = vector.shape_cast %261 : vector<16xf32> to vector<16x1xf32>
    %cst_119 = arith.constant 3.200000e+01 : f32
    %263 = vector.broadcast %cst_119 : f32 to vector<16x1xf32>
    %264 = arith.divf %262, %263 : vector<16x1xf32>
    %265 = vector.broadcast %264 : vector<16x1xf32> to vector<16x32xf32>
    %266 = arith.subf %256, %265 : vector<16x32xf32>
    %267 = arith.mulf %266, %266 : vector<16x32xf32>
    %cst_120 = arith.constant dense<0.000000e+00> : vector<16xf32>
    %268 = vector.multi_reduction <add>, %267, %cst_120 [1] : vector<16x32xf32> to vector<16xf32>
    %269 = vector.shape_cast %268 : vector<16xf32> to vector<16x1xf32>
    %cst_121 = arith.constant 3.200000e+01 : f32
    %270 = vector.broadcast %cst_121 : f32 to vector<16x1xf32>
    %271 = arith.divf %269, %270 : vector<16x1xf32>
    %272 = vector.broadcast %264 : vector<16x1xf32> to vector<16x32xf32>
    %273 = arith.subf %256, %272 : vector<16x32xf32>
    %cst_122 = arith.constant 9.99999996E-13 : f32
    %274 = vector.broadcast %cst_122 : f32 to vector<16x1xf32>
    %275 = arith.addf %271, %274 : vector<16x1xf32>
    %276 = math.rsqrt %275 : vector<16x1xf32>
    %277 = vector.broadcast %276 : vector<16x1xf32> to vector<16x32xf32>
    %278 = arith.mulf %273, %277 : vector<16x32xf32>
    %279 = vector.broadcast %258 : vector<1x32xf32> to vector<16x32xf32>
    %280 = arith.mulf %278, %279 : vector<16x32xf32>
    %281 = vector.broadcast %260 : vector<1x32xf32> to vector<16x32xf32>
    %282 = arith.addf %280, %281 : vector<16x32xf32>
    %c1_123 = arith.constant 1 : index
    %c0_124 = arith.constant 0 : index
    %c0_125 = arith.constant 0 : index
    %283 = vector.load %arg13[%c1_123, %c0_124, %c0_125] : memref<2x32x64xbf16, #tpu.memory_space<vmem>>, vector<1x32x64xbf16>
    %284 = vector.shape_cast %283 : vector<1x32x64xbf16> to vector<32x64xbf16>
    %285 = arith.truncf %282 : vector<16x32xf32> to vector<16x32xbf16>
    %cst_126 = arith.constant dense<0.000000e+00> : vector<16x64xf32>
    %286 = tpu.matmul %285, %284, %cst_126 {dimension_numbers = #tpu.dot_dimension_numbers<[1], [0], [0], [1], [0, 0, 1, 1], [], []>} : vector<16x32xbf16>, vector<32x64xbf16>, vector<16x64xf32> -> vector<16x64xf32>
    %c1_127 = arith.constant 1 : index
    %c0_128 = arith.constant 0 : index
    %c0_129 = arith.constant 0 : index
    %287 = vector.load %arg14[%c1_127, %c0_128, %c0_129] : memref<2x1x64xf32, #tpu.memory_space<vmem>>, vector<1x1x64xf32>
    %288 = vector.shape_cast %287 : vector<1x1x64xf32> to vector<1x64xf32>
    %289 = vector.broadcast %288 : vector<1x64xf32> to vector<16x64xf32>
    %290 = arith.addf %286, %289 : vector<16x64xf32>
    %cst_130 = arith.constant 5.000000e-01 : f32
    %291 = vector.broadcast %cst_130 : f32 to vector<16x64xf32>
    %292 = arith.mulf %291, %290 : vector<16x64xf32>
    %cst_131 = arith.constant 0.707106769 : f32
    %293 = vector.broadcast %cst_131 : f32 to vector<16x64xf32>
    %294 = arith.mulf %290, %293 : vector<16x64xf32>
    %295 = math.absf %294 : vector<16x64xf32>
    %cst_132 = arith.constant 0.327591091 : f32
    %296 = vector.broadcast %cst_132 : f32 to vector<16x64xf32>
    %297 = arith.mulf %296, %295 : vector<16x64xf32>
    %cst_133 = arith.constant 1.000000e+00 : f32
    %298 = vector.broadcast %cst_133 : f32 to vector<16x64xf32>
    %299 = arith.addf %298, %297 : vector<16x64xf32>
    %cst_134 = arith.constant 1.000000e+00 : f32
    %300 = vector.broadcast %cst_134 : f32 to vector<16x64xf32>
    %301 = arith.divf %300, %299 : vector<16x64xf32>
    %cst_135 = arith.constant 1.06140542 : f32
    %302 = vector.broadcast %cst_135 : f32 to vector<16x64xf32>
    %303 = arith.mulf %302, %301 : vector<16x64xf32>
    %cst_136 = arith.constant 1.45315206 : f32
    %304 = vector.broadcast %cst_136 : f32 to vector<16x64xf32>
    %305 = arith.subf %303, %304 : vector<16x64xf32>
    %306 = arith.mulf %305, %301 : vector<16x64xf32>
    %cst_137 = arith.constant 1.42141378 : f32
    %307 = vector.broadcast %cst_137 : f32 to vector<16x64xf32>
    %308 = arith.addf %306, %307 : vector<16x64xf32>
    %309 = arith.mulf %308, %301 : vector<16x64xf32>
    %cst_138 = arith.constant 0.284496725 : f32
    %310 = vector.broadcast %cst_138 : f32 to vector<16x64xf32>
    %311 = arith.subf %309, %310 : vector<16x64xf32>
    %312 = arith.mulf %311, %301 : vector<16x64xf32>
    %cst_139 = arith.constant 0.254829586 : f32
    %313 = vector.broadcast %cst_139 : f32 to vector<16x64xf32>
    %314 = arith.addf %312, %313 : vector<16x64xf32>
    %315 = arith.mulf %314, %301 : vector<16x64xf32>
    %cst_140 = arith.constant 0.000000e+00 : f32
    %316 = vector.broadcast %cst_140 : f32 to vector<16x64xf32>
    %317 = arith.subf %316, %295 : vector<16x64xf32>
    %318 = arith.mulf %317, %295 : vector<16x64xf32>
    %319 = math.exp %318 : vector<16x64xf32>
    %320 = arith.mulf %315, %319 : vector<16x64xf32>
    %cst_141 = arith.constant 1.000000e+00 : f32
    %321 = vector.broadcast %cst_141 : f32 to vector<16x64xf32>
    %322 = arith.subf %321, %320 : vector<16x64xf32>
    %cst_142 = arith.constant 0.000000e+00 : f32
    %323 = vector.broadcast %cst_142 : f32 to vector<16x64xf32>
    %324 = arith.cmpf oge, %294, %323 : vector<16x64xf32>
    %cst_143 = arith.constant 0.000000e+00 : f32
    %325 = vector.broadcast %cst_143 : f32 to vector<16x64xf32>
    %326 = arith.subf %325, %322 : vector<16x64xf32>
    %327 = arith.select %324, %322, %326 : vector<16x64xi1>, vector<16x64xf32>
    %cst_144 = arith.constant 1.000000e+00 : f32
    %328 = vector.broadcast %cst_144 : f32 to vector<16x64xf32>
    %329 = arith.addf %328, %327 : vector<16x64xf32>
    %330 = arith.mulf %292, %329 : vector<16x64xf32>
    %c1_145 = arith.constant 1 : index
    %c0_146 = arith.constant 0 : index
    %c0_147 = arith.constant 0 : index
    %331 = vector.load %arg15[%c1_145, %c0_146, %c0_147] : memref<2x64x32xbf16, #tpu.memory_space<vmem>>, vector<1x64x32xbf16>
    %332 = vector.shape_cast %331 : vector<1x64x32xbf16> to vector<64x32xbf16>
    %333 = arith.truncf %330 : vector<16x64xf32> to vector<16x64xbf16>
    %cst_148 = arith.constant dense<0.000000e+00> : vector<16x32xf32>
    %334 = tpu.matmul %333, %332, %cst_148 {dimension_numbers = #tpu.dot_dimension_numbers<[1], [0], [0], [1], [0, 0, 1, 1], [], []>} : vector<16x64xbf16>, vector<64x32xbf16>, vector<16x32xf32> -> vector<16x32xf32>
    %335 = arith.addf %256, %334 : vector<16x32xf32>
    %c1_149 = arith.constant 1 : index
    %c0_150 = arith.constant 0 : index
    %c0_151 = arith.constant 0 : index
    %336 = vector.load %arg16[%c1_149, %c0_150, %c0_151] : memref<2x1x32xf32, #tpu.memory_space<vmem>>, vector<1x1x32xf32>
    %337 = vector.shape_cast %336 : vector<1x1x32xf32> to vector<1x32xf32>
    %338 = vector.broadcast %337 : vector<1x32xf32> to vector<16x32xf32>
    %339 = arith.addf %335, %338 : vector<16x32xf32>
    %c0_152 = arith.constant 0 : index
    %c0_153 = arith.constant 0 : index
    %340 = vector.load %arg17[%c0_152, %c0_153] : memref<1x32xf32, #tpu.memory_space<vmem>>, vector<1x32xf32>
    %c0_154 = arith.constant 0 : index
    %c0_155 = arith.constant 0 : index
    %341 = vector.load %arg18[%c0_154, %c0_155] : memref<1x32xf32, #tpu.memory_space<vmem>>, vector<1x32xf32>
    %cst_156 = arith.constant dense<0.000000e+00> : vector<16xf32>
    %342 = vector.multi_reduction <add>, %339, %cst_156 [1] : vector<16x32xf32> to vector<16xf32>
    %343 = vector.shape_cast %342 : vector<16xf32> to vector<16x1xf32>
    %cst_157 = arith.constant 3.200000e+01 : f32
    %344 = vector.broadcast %cst_157 : f32 to vector<16x1xf32>
    %345 = arith.divf %343, %344 : vector<16x1xf32>
    %346 = vector.broadcast %345 : vector<16x1xf32> to vector<16x32xf32>
    %347 = arith.subf %339, %346 : vector<16x32xf32>
    %348 = arith.mulf %347, %347 : vector<16x32xf32>
    %cst_158 = arith.constant dense<0.000000e+00> : vector<16xf32>
    %349 = vector.multi_reduction <add>, %348, %cst_158 [1] : vector<16x32xf32> to vector<16xf32>
    %350 = vector.shape_cast %349 : vector<16xf32> to vector<16x1xf32>
    %cst_159 = arith.constant 3.200000e+01 : f32
    %351 = vector.broadcast %cst_159 : f32 to vector<16x1xf32>
    %352 = arith.divf %350, %351 : vector<16x1xf32>
    %353 = vector.broadcast %345 : vector<16x1xf32> to vector<16x32xf32>
    %354 = arith.subf %339, %353 : vector<16x32xf32>
    %cst_160 = arith.constant 9.99999996E-13 : f32
    %355 = vector.broadcast %cst_160 : f32 to vector<16x1xf32>
    %356 = arith.addf %352, %355 : vector<16x1xf32>
    %357 = math.rsqrt %356 : vector<16x1xf32>
    %358 = vector.broadcast %357 : vector<16x1xf32> to vector<16x32xf32>
    %359 = arith.mulf %354, %358 : vector<16x32xf32>
    %360 = vector.broadcast %340 : vector<1x32xf32> to vector<16x32xf32>
    %361 = arith.mulf %359, %360 : vector<16x32xf32>
    %362 = vector.broadcast %341 : vector<1x32xf32> to vector<16x32xf32>
    %363 = arith.addf %361, %362 : vector<16x32xf32>
    %364 = vector.shape_cast %363 : vector<16x32xf32> to vector<2x8x32xf32>
    %365 = vector.extract_strided_slice %364 {offsets = [0, 0, 0], sizes = [2, 1, 32], strides = [1, 1, 1]} : vector<2x8x32xf32> to vector<2x1x32xf32>
    %366 = vector.shape_cast %365 : vector<2x1x32xf32> to vector<2x32xf32>
    %c0_161 = arith.constant 0 : index
    %c0_162 = arith.constant 0 : index
    %367 = vector.load %arg19[%c0_161, %c0_162] : memref<32x32xbf16, #tpu.memory_space<vmem>>, vector<32x32xbf16>
    %368 = arith.truncf %366 : vector<2x32xf32> to vector<2x32xbf16>
    %cst_163 = arith.constant dense<0.000000e+00> : vector<2x32xf32>
    %369 = tpu.matmul %368, %367, %cst_163 {dimension_numbers = #tpu.dot_dimension_numbers<[1], [0], [0], [1], [0, 0, 1, 1], [], []>} : vector<2x32xbf16>, vector<32x32xbf16>, vector<2x32xf32> -> vector<2x32xf32>
    %c0_164 = arith.constant 0 : index
    %c0_165 = arith.constant 0 : index
    %370 = vector.load %arg20[%c0_164, %c0_165] : memref<1x32xf32, #tpu.memory_space<vmem>>, vector<1x32xf32>
    %371 = vector.broadcast %370 : vector<1x32xf32> to vector<2x32xf32>
    %372 = arith.addf %369, %371 : vector<2x32xf32>
    %373 = math.tanh %372 : vector<2x32xf32>
    %c0_166 = arith.constant 0 : index
    %c0_167 = arith.constant 0 : index
    %374 = vector.load %arg21[%c0_166, %c0_167] : memref<2x32xf32, #tpu.memory_space<vmem>>, vector<2x32xf32>
    tpu.vector_store %arg21[%c0_166, %c0_167], %373 {strides = array<i32>} : memref<2x32xf32, #tpu.memory_space<vmem>>, vector<2x32xf32>,
    return
  }
  func.func @transform_0(%arg0: i32) -> (i32, i32) {
    %c0_i32 = arith.constant 0 : i32
    %c0_i32_0 = arith.constant 0 : i32
    %c0_i32_1 = arith.constant 0 : i32
    return %c0_i32, %c0_i32_0 : i32, i32
  }
  func.func @transform_1(%arg0: i32) -> (i32, i32) {
    %c0_i32 = arith.constant 0 : i32
    %c0_i32_0 = arith.constant 0 : i32
    %c0_i32_1 = arith.constant 0 : i32
    return %c0_i32, %c0_i32_0 : i32, i32
  }
  func.func @transform_2(%arg0: i32) -> (i32, i32) {
    %c0_i32 = arith.constant 0 : i32
    %c0_i32_0 = arith.constant 0 : i32
    %c0_i32_1 = arith.constant 0 : i32
    return %c0_i32, %c0_i32_0 : i32, i32
  }
  func.func @transform_3(%arg0: i32) -> (i32, i32) {
    %c0_i32 = arith.constant 0 : i32
    %c0_i32_0 = arith.constant 0 : i32
    %c0_i32_1 = arith.constant 0 : i32
    return %c0_i32, %c0_i32_0 : i32, i32
  }
  func.func @transform_4(%arg0: i32) -> (i32, i32, i32) {
    %c0_i32 = arith.constant 0 : i32
    %c0_i32_0 = arith.constant 0 : i32
    %c0_i32_1 = arith.constant 0 : i32
    %c0_i32_2 = arith.constant 0 : i32
    return %c0_i32, %c0_i32_0, %c0_i32_1 : i32, i32, i32
  }
  func.func @transform_5(%arg0: i32) -> (i32, i32, i32) {
    %c0_i32 = arith.constant 0 : i32
    %c0_i32_0 = arith.constant 0 : i32
    %c0_i32_1 = arith.constant 0 : i32
    %c0_i32_2 = arith.constant 0 : i32
    return %c0_i32, %c0_i32_0, %c0_i32_1 : i32, i32, i32
  }
  func.func @transform_6(%arg0: i32) -> (i32, i32, i32) {
    %c0_i32 = arith.constant 0 : i32
    %c0_i32_0 = arith.constant 0 : i32
    %c0_i32_1 = arith.constant 0 : i32
    %c0_i32_2 = arith.constant 0 : i32
    return %c0_i32, %c0_i32_0, %c0_i32_1 : i32, i32, i32
  }
  func.func @transform_7(%arg0: i32) -> (i32, i32, i32) {
    %c0_i32 = arith.constant 0 : i32
    %c0_i32_0 = arith.constant 0 : i32
    %c0_i32_1 = arith.constant 0 : i32
    %c0_i32_2 = arith.constant 0 : i32
    return %c0_i32, %c0_i32_0, %c0_i32_1 : i32, i32, i32
  }
  func.func @transform_8(%arg0: i32) -> (i32, i32, i32) {
    %c0_i32 = arith.constant 0 : i32
    %c0_i32_0 = arith.constant 0 : i32
    %c0_i32_1 = arith.constant 0 : i32
    %c0_i32_2 = arith.constant 0 : i32
    return %c0_i32, %c0_i32_0, %c0_i32_1 : i32, i32, i32
  }
  func.func @transform_9(%arg0: i32) -> (i32, i32, i32) {
    %c0_i32 = arith.constant 0 : i32
    %c0_i32_0 = arith.constant 0 : i32
    %c0_i32_1 = arith.constant 0 : i32
    %c0_i32_2 = arith.constant 0 : i32
    return %c0_i32, %c0_i32_0, %c0_i32_1 : i32, i32, i32
  }
  func.func @transform_10(%arg0: i32) -> (i32, i32, i32) {
    %c0_i32 = arith.constant 0 : i32
    %c0_i32_0 = arith.constant 0 : i32
    %c0_i32_1 = arith.constant 0 : i32
    %c0_i32_2 = arith.constant 0 : i32
    return %c0_i32, %c0_i32_0, %c0_i32_1 : i32, i32, i32
  }
  func.func @transform_11(%arg0: i32) -> (i32, i32, i32) {
    %c0_i32 = arith.constant 0 : i32
    %c0_i32_0 = arith.constant 0 : i32
    %c0_i32_1 = arith.constant 0 : i32
    %c0_i32_2 = arith.constant 0 : i32
    return %c0_i32, %c0_i32_0, %c0_i32_1 : i32, i32, i32
  }
  func.func @transform_12(%arg0: i32) -> (i32, i32, i32) {
    %c0_i32 = arith.constant 0 : i32
    %c0_i32_0 = arith.constant 0 : i32
    %c0_i32_1 = arith.constant 0 : i32
    %c0_i32_2 = arith.constant 0 : i32
    return %c0_i32, %c0_i32_0, %c0_i32_1 : i32, i32, i32
  }
  func.func @transform_13(%arg0: i32) -> (i32, i32, i32) {
    %c0_i32 = arith.constant 0 : i32
    %c0_i32_0 = arith.constant 0 : i32
    %c0_i32_1 = arith.constant 0 : i32
    %c0_i32_2 = arith.constant 0 : i32
    return %c0_i32, %c0_i32_0, %c0_i32_1 : i32, i32, i32
  }
  func.func @transform_14(%arg0: i32) -> (i32, i32, i32) {
    %c0_i32 = arith.constant 0 : i32
    %c0_i32_0 = arith.constant 0 : i32
    %c0_i32_1 = arith.constant 0 : i32
    %c0_i32_2 = arith.constant 0 : i32
    return %c0_i32, %c0_i32_0, %c0_i32_1 : i32, i32, i32
  }
  func.func @transform_15(%arg0: i32) -> (i32, i32, i32) {
    %c0_i32 = arith.constant 0 : i32
    %c0_i32_0 = arith.constant 0 : i32
    %c0_i32_1 = arith.constant 0 : i32
    %c0_i32_2 = arith.constant 0 : i32
    return %c0_i32, %c0_i32_0, %c0_i32_1 : i32, i32, i32
  }
  func.func @transform_16(%arg0: i32) -> (i32, i32) {
    %c0_i32 = arith.constant 0 : i32
    %c0_i32_0 = arith.constant 0 : i32
    %c0_i32_1 = arith.constant 0 : i32
    return %c0_i32, %c0_i32_0 : i32, i32
  }
  func.func @transform_17(%arg0: i32) -> (i32, i32) {
    %c0_i32 = arith.constant 0 : i32
    %c0_i32_0 = arith.constant 0 : i32
    %c0_i32_1 = arith.constant 0 : i32
    return %c0_i32, %c0_i32_0 : i32, i32
  }
  func.func @transform_18(%arg0: i32) -> (i32, i32) {
    %c0_i32 = arith.constant 0 : i32
    %c0_i32_0 = arith.constant 0 : i32
    %c0_i32_1 = arith.constant 0 : i32
    return %c0_i32, %c0_i32_0 : i32, i32
  }
  func.func @transform_19(%arg0: i32) -> (i32, i32) {
    %c0_i32 = arith.constant 0 : i32
    %c0_i32_0 = arith.constant 0 : i32
    %c0_i32_1 = arith.constant 0 : i32
    return %c0_i32, %c0_i32_0 : i32, i32
  }
  func.func @transform_20(%arg0: i32) -> (i32, i32) {
    %c0_i32 = arith.constant 0 : i32
    %c0_i32_0 = arith.constant 0 : i32
    %c0_i32_1 = arith.constant 0 : i32
    return %c0_i32, %c0_i32_0 : i32, i32
  }
}

</mosaic_0001>

<bundles_post_ra>
// kernel: visual_encoder_forward.1
= control target key start
LH: loop header
LB: loop body
LE: loop exit
PB: predicated region body
PF: predicated region fallthrough
CT: control target
= control target key end

     0   :  { %s3345_s0 = inlined_call_operand.vmem [shape: bf16[16,768], index: 0, kind: input, shape index: {}]   ;;  %s3346_s1 = inlined_call_operand.vmem [shape: bf16[768,32], index: 1, kind: input, shape index: {}]   ;;  %s3347_s2 = inlined_call_operand.vmem [shape: f32[16,32], index: 2, kind: input, shape index: {}]   ;;  %s3348_s3 = inlined_call_operand.vmem [shape: f32[16,16], index: 3, kind: input, shape index: {}]   ;;  %s3349_s4 = inlined_call_operand.vmem [shape: f32[2,1,32], index: 4, kind: input, shape index: {}]   ;;  %s3350_s5 = inlined_call_operand.vmem [shape: f32[2,1,32], index: 5, kind: input, shape index: {}]   ;;  %s3351_s6 = inlined_call_operand.vmem [shape: bf16[2,32,96], index: 6, kind: input, shape index: {}]   ;;  %s3352_s7 = inlined_call_operand.vmem [shape: f32[2,1,96], index: 7, kind: input, shape index: {}]   ;;  %s3353_s8 = inlined_call_operand.vmem [shape: bf16[2,32,32], index: 8, kind: input, shape index: {}]   ;;  %s3354_s9 = inlined_call_operand.vmem [shape: f32[2,1,32], index: 9, kind: input, shape index: {}]   ;;  %s3355_s10 = inlined_call_operand.vmem [shape: f32[2,1,32], index: 10, kind: input, shape index: {}]   ;;  %s3356_s11 = inlined_call_operand.vmem [shape: f32[2,1,32], index: 11, kind: input, shape index: {}]   ;;  %s3357_s12 = inlined_call_operand.vmem [shape: bf16[2,32,64], index: 12, kind: input, shape index: {}]   ;;  %s3358_s13 = inlined_call_operand.vmem [shape: f32[2,1,64], index: 13, kind: input, shape index: {}]   ;;  %s3359_s14 = inlined_call_operand.vmem [shape: bf16[2,64,32], index: 14, kind: input, shape index: {}]   ;;  %s3360_s15 = inlined_call_operand.vmem [shape: f32[2,1,32], index: 15, kind: input, shape index: {}]   ;;  %s3361_s16 = inlined_call_operand.vmem [shape: f32[1,32], index: 16, kind: input, shape index: {}]   ;;  %s3362_s17 = inlined_call_operand.vmem [shape: f32[1,32], index: 17, kind: input, shape index: {}]   ;;  %s3363_s18 = inlined_call_operand.vmem [shape: bf16[32,32], index: 18, kind: input, shape index: {}]   ;;  %s3364_s19 = inlined_call_operand.vmem [shape: f32[1,32], index: 19, kind: input, shape index: {}]   ;;  %s3365_s20 = inlined_call_operand.hbm [shape: f32[2,32], index: 20, kind: output, shape index: {}]  }
   0x1   :  { %3371 = sst [smem:[#allocation5_spill]] %s3345_s0 }
   0x2   :  { %3372 = sst [smem:[#allocation6_spill]] %s3346_s1 }
   0x3   :  { %3373 = sst [smem:[#allocation7_spill]] %s3347_s2 }
   0x4   :  { %3374 = sst [smem:[#allocation8_spill]] %s3348_s3 }
   0x5   :  { %3375 = sst [smem:[#allocation9_spill]] %s3349_s4 }
   0x6   :  { %s3376_s23 = sld [smem:[#allocation6_spill]] }
   0x7   :  { %s3377_s28 = sld [smem:[#allocation5_spill]] }
   0xc   :  { %v2555_v0 = vld [vmem:[%s3376_s23 + $0x78] sm:$0xff]   ;;  %v2559_v4 = vld [vmem:[%s3376_s23 + $0x70] sm:$0xff]   ;;  %v2563_v8 = vld [vmem:[%s3376_s23 + $0x68] sm:$0xff]  }
   0xd   :  { %v2556_v1 = vld [vmem:[%s3376_s23 + $0x38] sm:$0xff]   ;;  %2295 = vmatprep.subr.bf16.mxu0 %v2555_v0  ;;  %v2560_v5 = vld [vmem:[%s3376_s23 + $0x30] sm:$0xff]   ;;  %v2564_v9 = vld [vmem:[%s3376_s23 + $0x28] sm:$0xff]  }
   0xe   :  { %v2557_v2 = vld [vmem:[%s3376_s23 + $0xf8] sm:$0xff]   ;;  %2296 = vmatpush3.bf16.msra.mxu0 %v2556_v1  ;;  %v2561_v6 = vld [vmem:[%s3376_s23 + $0xf0] sm:$0xff]   ;;  %v2565_v10 = vld [vmem:[%s3376_s23 + $0xe8] sm:$0xff]  }
   0xf   :  { %v2558_v3 = vld [vmem:[%s3376_s23 + $0xb8] sm:$0xff]   ;;  %2317 = vmatprep.subr.bf16.mxu1 %v2557_v2  ;;  %2297 = vmatprep.subr.bf16.mxu0 %v2559_v4  ;;  %v2562_v7 = vld [vmem:[%s3376_s23 + $0xb0] sm:$0xff]   ;;  %v2566_v11 = vld [vmem:[%s3376_s23 + $0xa8] sm:$0xff]  }
  0x10   :  { %2318 = vmatpush3.bf16.msra.mxu1 %v2558_v3  ;;  %v2567_v12 = vld [vmem:[%s3376_s23 + $0x60] sm:$0xff]   ;;  %v2571_v16 = vld [vmem:[%s3376_s23 + $0x58] sm:$0xff]   ;;  %v2575_v20 = vld [vmem:[%s3376_s23 + $0x50] sm:$0xff]  }
  0x11   :  { %2319 = vmatprep.subr.bf16.mxu1 %v2561_v6  ;;  %v2568_v13 = vld [vmem:[%s3376_s23 + $0x20] sm:$0xff]   ;;  %v2572_v17 = vld [vmem:[%s3376_s23 + $0x18] sm:$0xff]   ;;  %v2576_v21 = vld [vmem:[%s3376_s23 + $0x10] sm:$0xff]  }
  0x12   :  { %2298 = vmatpush3.bf16.msra.mxu0 %v2560_v5  ;;  %v2569_v14 = vld [vmem:[%s3376_s23 + $0xe0] sm:$0xff]   ;;  %v2573_v18 = vld [vmem:[%s3376_s23 + $0xd8] sm:$0xff]   ;;  %v2577_v22 = vld [vmem:[%s3376_s23 + $0xd0] sm:$0xff]  }
  0x13   :  { %2299 = vmatprep.subr.bf16.mxu0 %v2563_v8  ;;  %v2570_v15 = vld [vmem:[%s3376_s23 + $0xa0] sm:$0xff]   ;;  %v2574_v19 = vld [vmem:[%s3376_s23 + $0x98] sm:$0xff]   ;;  %v2578_v23 = vld [vmem:[%s3376_s23 + $0x90] sm:$0xff]  }
  0x14   :  { %2320 = vmatpush3.bf16.msra.mxu1 %v2562_v7  ;;  %v2579_v24 = vld [vmem:[%s3376_s23 + $0x48] sm:$0xff]   ;;  %v2583_v28 = vld [vmem:[%s3376_s23 + $0x40] sm:$0xff]   ;;  %v2590_v34 = vld [vmem:[%s3376_s23 + $0x178] sm:$0xff]  }
  0x15   :  { %2321 = vmatprep.subr.bf16.mxu1 %v2565_v10  ;;  %v2580_v25 = vld [vmem:[%s3376_s23 + $0x8] sm:$0xff]   ;;  %v2584_v29 = vld [vmem:[%s3376_s23] sm:$0xff]   ;;  %v2594_v37 = vld [vmem:[%s3376_s23 + $0x138] sm:$0xff]  }
  0x16   :  { %2300 = vmatpush3.bf16.msra.mxu0 %v2564_v9  ;;  %v2581_v26 = vld [vmem:[%s3376_s23 + $0xc8] sm:$0xff]   ;;  %v2585_v30 = vld [vmem:[%s3376_s23 + $0xc0] sm:$0xff]   ;;  %v2595_v38 = vld [vmem:[%s3376_s23 + $0x170] sm:$0xff]  }
  0x17   :  { %2301 = vmatprep.subr.bf16.mxu0 %v2567_v12  ;;  %v2582_v27 = vld [vmem:[%s3376_s23 + $0x88] sm:$0xff]   ;;  %v2586_v31 = vld [vmem:[%s3377_s28] ss:$24 sps:$4 sm:$0xff]   ;;  %v2588_v32 = vld [vmem:[%s3377_s28 + $0x4] ss:$24 sps:$4 sm:$0xff]  }
  0x18   :  { %2322 = vmatpush3.bf16.msra.mxu1 %v2566_v11  ;;  %v2589_v33 = vld [vmem:[%s3376_s23 + $0x80] sm:$0xff]   ;;  %523 = vmatprep.mubr.bf16.mxu0 %v2588_v32  ;;  %v2596_v39 = vld [vmem:[%s3376_s23 + $0x130] sm:$0xff]   ;;  %v2597_v40 = vld [vmem:[%s3376_s23 + $0x168] sm:$0xff]  }
  0x19   :  { %2323 = vmatprep.subr.bf16.mxu1 %v2569_v14  ;;  %v2591_v35 = vld [vmem:[%s3377_s28 + $0x8] ss:$24 sps:$4 sm:$0xff]   ;;  %v2593_v36 = vld [vmem:[%s3377_s28 + $0xc] ss:$24 sps:$4 sm:$0xff]   ;;  %v2601_v44 = vld [vmem:[%s3376_s23 + $0x158] sm:$0xff]  }
  0x1a   :  { %2302 = vmatpush3.bf16.msra.mxu0 %v2568_v13  ;;  %564 = vmatprep.mubr.bf16.mxu1 %v2593_v36  ;;  %v2598_v41 = vld [vmem:[%s3376_s23 + $0x128] sm:$0xff]   ;;  %v2599_v42 = vld [vmem:[%s3376_s23 + $0x160] sm:$0xff]   ;;  %v2602_v45 = vld [vmem:[%s3376_s23 + $0x118] sm:$0xff]  }
  0x1b   :  { %2303 = vmatprep.subr.bf16.mxu0 %v2571_v16  ;;  %v2600_v43 = vld [vmem:[%s3376_s23 + $0x120] sm:$0xff]   ;;  %v2603_v46 = vld [vmem:[%s3376_s23 + $0x150] sm:$0xff]   ;;  %v2605_v49 = vld [vmem:[%s3376_s23 + $0x148] sm:$0xff]  }
  0x1c   :  { %2324 = vmatpush3.bf16.msra.mxu1 %v2570_v15  ;;  %v2611_v47 = vld [vmem:[%s3377_s28 + $0x14] ss:$24 sps:$4 sm:$0xff]   ;;  %v2607_v51 = vld [vmem:[%s3376_s23 + $0x140] sm:$0xff]   ;;  %v2609_v53 = vld [vmem:[%s3377_s28 + $0x10] ss:$24 sps:$4 sm:$0xff]  }
  0x1d   :  { %2325 = vmatprep.subr.bf16.mxu1 %v2573_v18  ;;  %v2604_v48 = vld [vmem:[%s3376_s23 + $0x110] sm:$0xff]   ;;  %v2606_v50 = vld [vmem:[%s3376_s23 + $0x108] sm:$0xff]   ;;  %v2608_v52 = vld [vmem:[%s3376_s23 + $0x100] sm:$0xff]  }
  0x1e   :  { %2304 = vmatpush3.bf16.msra.mxu0 %v2572_v17 }
  0x1f   :  { %2305 = vmatprep.subr.bf16.mxu0 %v2575_v20 }
  0x20   :  { %2326 = vmatpush3.bf16.msra.mxu1 %v2574_v19 }
  0x21   :  { %2327 = vmatprep.subr.bf16.mxu1 %v2577_v22 }
  0x22   :  { %2306 = vmatpush3.bf16.msra.mxu0 %v2576_v21 }
  0x23   :  { %2307 = vmatprep.subr.bf16.mxu0 %v2579_v24 }
  0x24   :  { %2328 = vmatpush3.bf16.msra.mxu1 %v2578_v23 }
  0x25   :  { %2329 = vmatprep.subr.bf16.mxu1 %v2581_v26 }
  0x26   :  { %2308 = vmatpush3.bf16.msra.mxu0 %v2580_v25 }
  0x27   :  { %2309 = vmatprep.subr.bf16.mxu0 %v2583_v28 }
  0x28   :  { %2330 = vmatpush3.bf16.msra.mxu1 %v2582_v27 }
  0x29   :  { %2331 = vmatprep.subr.bf16.mxu1 %v2585_v30 }
  0x2a   :  { %2310 = vmatpush3.bf16.msra.mxu0 %v2584_v29 }
  0x2b   :  { %2339 = vmatprep.subr.bf16.mxu0 %v2590_v34 }
  0x2c   :  { %2332 = vmatpush3.bf16.msra.mxu1 %v2589_v33 }
  0x2d   :  { %524 = vmatmul.mubr.bf16.vlgmr.msra.gmra.mxu0 %v2586_v31 }
  0x2e   :  { %2340 = vmatpush3.bf16.msra.mxu0 %v2594_v37  ;;  %605 = vmatprep.mubr.bf16.mxu0 %v2611_v47 }
  0x2f   :  { %565 = vmatmul.mubr.bf16.vlgmr.msra.gmra.mxu1 %v2591_v35  ;;  %2341 = vmatprep.subr.bf16.mxu0 %v2595_v38 }
  0x32   :  { %2342 = vmatpush3.bf16.msra.mxu0 %v2596_v39 }
  0x33   :  { %2343 = vmatprep.subr.bf16.mxu0 %v2597_v40 }
  0x36   :  { %2344 = vmatpush3.bf16.msra.mxu0 %v2598_v41 }
  0x37   :  { %2345 = vmatprep.subr.bf16.mxu0 %v2599_v42 }
  0x3a   :  { %2346 = vmatpush3.bf16.msra.mxu0 %v2600_v43 }
  0x3b   :  { %2347 = vmatprep.subr.bf16.mxu0 %v2601_v44 }
  0x3e   :  { %2348 = vmatpush3.bf16.msra.mxu0 %v2602_v45 }
  0x3f   :  { %2349 = vmatprep.subr.bf16.mxu0 %v2603_v46 }
  0x42   :  { %2350 = vmatpush3.bf16.msra.mxu0 %v2604_v48 }
  0x43   :  { %2351 = vmatprep.subr.bf16.mxu0 %v2605_v49 }
  0x46   :  { %2352 = vmatpush3.bf16.msra.mxu0 %v2606_v50 }
  0x47   :  { %2353 = vmatprep.subr.bf16.mxu0 %v2607_v51 }
  0x4a   :  { %2354 = vmatpush3.bf16.msra.mxu0 %v2608_v52 }
  0x4b   :  { %25 = vsyncpa [#allocation3], 0  ;;  %s3378_s24 = sld [smem:[#allocation7_spill]]  ;;  %vm616_vm0 = vcmask 261120   ;;  %v2612_v28 = vld [vmem:[%s3351_s6 + $0x8] sm:$0xff]   ;;  %v2726_v29 = vmov 0.0  }
  0x4c   :  { %2408 = vmatprep.subr.bf16.mxu1 %v2726_v29  ;;  %2434 = vmatprep.subr.bf16.mxu0 %v2726_v29  ;;  %v2613_v30 = vld [vmem:[%s3351_s6] sm:$0xff]   ;;  %vm2727_vm1 = vmmov 0   ;;  %s3379_s29 = sld [smem:[#allocation9_spill]]  ;;  %s2728_s22 = smov 96   ;;  %vm732_vm2 = vcmask 130048   ;;  %vm1252_vm5 = vcmask 523264  }
  0x4d   :  { %606 = vmatmul.mubr.bf16.vlgmr.msra.gmra.mxu0 %v2609_v53  ;;  %2409 = vmatpush3.bf16.msra.mxu1 %v2612_v28  ;;  %v2202_v43 = vld [vmem:[%s3350_s5] ss:$0 sm:$0xff]  ;;  %s2730_s23 = smov 112   ;;  %s3380_s25 = sld [smem:[#allocation8_spill]]  ;;  %vm2072_vm8 = vcmask 1041409   ;;  %vm2131_vm9 = vcmask 254976  }
  0x4e   :  { %2412 = vmatprep.mubr.msk.bf16.mxu1 %vm2727_vm1, %v2726_v29  ;;  %2410 = vmatprep.subr.bf16.mxu1 %v2726_v29  ;;  %v2203_v49 = vld [vmem:[%s3352_s7] ss:$0 sm:$0xff]  ;;  %s2731_s27 = smov 64   ;;  %s2732_s4 = smov 48  }
  0x4f   :  { %2436 = vmatprep.mubr.msk.bf16.mxu0 %vm2727_vm1, %v2726_v29  ;;  %s2733_s28 = smov 16  }
  0x51   :  { %v171_v60 = vld [vmem:[%s3378_s24] sm:$0xff]  ;;  %v172_v2 = vld [vmem:[%s3378_s24 + $0x8] sm:$0xff]  ;;  %2411 = vmatpush3.bf16.msra.mxu1 %v2613_v30  ;;  %s2729_s24 = smov 80  }
  0x52   :  { %2416 = vmatprep.subr.bf16.mxu1 %v2726_v29  ;;  %v2201_v39 = vld [vmem:[%s3379_s29] ss:$0 sm:$0xff] }
  0xed   :  { %v2311_v54 = vpop.f32.mrf.mxu0 }
  0xef   :  { %v2312_v55 = vpop.f32.mrf.mxu0  ;;  %v2333_v56 = vpop.f32.mrf.mxu1 }
  0xf0   :  { %v2313_v59 = vadd.f32 %v2312_v55, %v2311_v54 }
  0xf1   :  { %v2314_v57 = vpop.f32.mrf.mxu0  ;;  %v2334_v58 = vpop.f32.mrf.mxu1 }
  0xf2   :  { %v526_v63 = vadd.f32 %v2313_v59, %v171_v60  ;;  %v2335_v0 = vadd.f32 %v2334_v58, %v2333_v56  ;;  %v3063_v58 = vld [vmem:[%s3380_s25] sm:$0xff] }
  0xf3   :  { %v2315_v61 = vpop.f32.mrf.mxu0  ;;  %v2336_v62 = vpop.f32.mrf.mxu1 }
  0xf4   :  { %v2316_v1 = vadd.f32 %v2315_v61, %v2314_v57  ;;  %v567_v6 = vadd.f32 %v2335_v0, %v526_v63 }
  0xf5   :  { %v2337_v3 = vpop.f32.mrf.mxu1 }
  0xf6   :  { %v529_v7 = vadd.f32 %v2316_v1, %v172_v2  ;;  %v2338_v8 = vadd.f32 %v2337_v3, %v2336_v62  ;;  %v3069_v62 = vld [vmem:[%s3380_s25 + $0x8] sm:$0xff] }
  0xf8   :  { %v570_v13 = vadd.f32 %v2338_v8, %v529_v7 }
 0x10d   :  { %v2355_v4 = vpop.f32.mrf.mxu0 }
 0x10f   :  { %v2356_v5 = vpop.f32.mrf.mxu0 }
 0x110   :  { %v2357_v9 = vadd.f32 %v2356_v5, %v2355_v4 }
 0x111   :  { %v2358_v10 = vpop.f32.mrf.mxu0 }
 0x112   :  { %v3008_v11 = vadd.f32 %v2357_v9, %v567_v6 }
 0x113   :  { %v2359_v12 = vpop.f32.mrf.mxu0 }
 0x114   :  { %v2360_v14 = vadd.f32 %v2359_v12, %v2358_v10  ;;  %v617_v15 = vsel %vm616_vm0, %v3008_v11, 0.0 }
 0x115   :  { %618 = vadd.xlane.f32.xlu0 %v617_v15 }
 0x116   :  { %v3012_v16 = vadd.f32 %v2360_v14, %v570_v13 }
 0x118   :  { %v620_v17 = vsel %vm616_vm0, %v3012_v16, 0.0 }
 0x119   :  { %621 = vadd.xlane.f32.xlu0 %v620_v17 }
 0x19e   :  { %v619_v18 = vpop.xlane.xlu0 %618 }
 0x19f   :  { %v624_v19 = vmul.f32 0.03125, %v619_v18 }
 0x1a1   :  { %v626_v20 = vsub.f32 %v3008_v11, %v624_v19 }
 0x1a2   :  { %v622_v21 = vpop.xlane.xlu0 %621 }
 0x1a3   :  { %v625_v22 = vmul.f32 0.03125, %v622_v21  ;;  %v628_v23 = vmul.f32 %v626_v20, %v626_v20 }
 0x1a5   :  { %v627_v24 = vsub.f32 %v3012_v16, %v625_v22  ;;  %v630_v25 = vsel %vm616_vm0, %v628_v23, 0.0 }
 0x1a6   :  { %631 = vadd.xlane.f32.xlu1 %v630_v25 }
 0x1a7   :  { %v629_v26 = vmul.f32 %v627_v24, %v627_v24 }
 0x1a9   :  { %v633_v27 = vsel %vm616_vm0, %v629_v26, 0.0 }
 0x1aa   :  { %634 = vadd.xlane.f32.xlu1 %v633_v27 }
 0x22f   :  { %v632_v31 = vpop.xlane.xlu1 %631 }
 0x230   :  { %v636_v32 = vmul.f32 0.03125, %v632_v31 }
 0x232   :  { %v638_v33 = vadd.f32 1e-12, %v636_v32 }
 0x233   :  { %v635_v34 = vpop.xlane.xlu1 %634 }
 0x234   :  { %2634 = vrsqrt.f32 %v638_v33  ;;  %v637_v35 = vmul.f32 0.03125, %v635_v34 }
 0x236   :  { %v639_v36 = vadd.f32 1e-12, %v637_v35 }
 0x238   :  { %2636 = vrsqrt.f32 %v639_v36 }
 0x241   :  { %v2635_v37 = vpop.eup %2634 }
 0x242   :  { %v642_v38 = vmul.f32 %v2635_v37, %v626_v20 }
 0x244   :  { %v650_v42 = vmul.f32 %v2201_v39, %v642_v38 }
 0x245   :  { %v2637_v40 = vpop.eup %2636 }
 0x246   :  { %v643_v41 = vmul.f32 %v2637_v40, %v627_v24  ;;  %v658_v45 = vadd.f32 %v2202_v43, %v650_v42 }
 0x248   :  { %v651_v44 = vmul.f32 %v2201_v39, %v643_v41 }
 0x24a   :  { %v659_v46 = vadd.f32 %v2202_v43, %v651_v44 }
 0x24c   :  { %v664_v47 = vpack.c.bf16 %v659_v46, %v658_v45 }
 0x24e   :  { %2413 = vmatmul.mubr.msk.bf16.vlgmr.msra.gmra.mxu1 %vm616_vm0, %v664_v47 }
 0x24f   :  { %2418 = vmatprep.mubr.msk.bf16.mxu1 %vm2727_vm1, %v2726_v29 }
 0x30e   :  { %v721_v48 = vpop.f32.mrf.mxu1 }
 0x30f   :  { %v722_v52 = vadd.f32 %v2203_v49, %v721_v48 }
 0x310   :  { %v2414_v50 = vpop.f32.mrf.mxu1 }
 0x312   :  { %v724_v51 = vpop.f32.mrf.mxu1 }
 0x313   :  { %v725_v53 = vadd.f32 %v2203_v49, %v724_v51 }
 0x314   :  { %v2415_v54 = vpop.f32.mrf.mxu1 }
 0x315   :  { %v3046_v55 = vpack.c.bf16 %v725_v53, %v722_v52 }
 0x317   :  { %730 = vrot.lane.b32.xlu0 %v3046_v55, %s2728_s22 }
 0x31b   :  { %852 = vrot.lane.b32.xlu0 %v3046_v55, %s2729_s24 }
 0x31f   :  { %850 = vrot.lane.b32.xlu0 %v3046_v55, %s2730_s23 }
 0x389   :  { %v731_v56 = vpop.permute.xlu0 %730 }
 0x38a   :  { %v737_v57 = vsel %vm732_vm2, %v731_v56, 0 }
 0x38b   :  { %2417 = vmatpush3.bf16.xpose.msra.mxu1 %v737_v57 }
 0x38c   :  { %2422 = vmatprep.subr.bf16.mxu1 %v2726_v29 }
 0x38d   :  { %v853_v23 = vpop.permute.xlu0 %852 }
 0x38e   :  { %v858_v25 = vsel %vm732_vm2, %v853_v23, 0 }
 0x391   :  { %v851_v26 = vpop.permute.xlu0 %850 }
 0x392   :  { %2419 = vmatmul.mubr.msk.bf16.vlgmr.msra.gmra.mxu1 %vm732_vm2, %v3046_v55 }
 0x393   :  { %2424 = vmatprep.mubr.msk.bf16.mxu1 %vm2727_vm1, %v2726_v29 }
 0x452   :  { %v773_v59 = vpop.f32.mrf.mxu1 }
 0x453   :  { %v774_v60 = vadd.f32 %v773_v59, %v3063_v58 }
 0x454   :  { %v2420_v61 = vpop.f32.mrf.mxu1 }
 0x455   :  { %v780_v63 = vsel %vm732_vm2, %v774_v60, -inf }
 0x456   :  { %v776_v0 = vpop.f32.mrf.mxu1  ;;  %781 = vmax.xlane.f32.xlu1 %v780_v63 }
 0x457   :  { %v777_v1 = vadd.f32 %v776_v0, %v3069_v62 }
 0x458   :  { %v2421_v2 = vpop.f32.mrf.mxu1 }
 0x459   :  { %v783_v3 = vsel %vm732_vm2, %v777_v1, -inf }
 0x45a   :  { %784 = vmax.xlane.f32.xlu1 %v783_v3 }
 0x4df   :  { %v782_v4 = vpop.xlane.xlu1 %781 }
 0x4e0   :  { %v786_v5 = vsub.f32 %v774_v60, %v782_v4  ;;  %v2615_v60 = vld [vmem:[%s3353_s8] sm:$0xff]  }
 0x4e2   :  { %v788_v6 = vmul.f32 1.442695, %v786_v5 }
 0x4e3   :  { %v785_v7 = vpop.xlane.xlu1 %784 }
 0x4e4   :  { %2638 = vpow2.f32 %v788_v6  ;;  %v787_v8 = vsub.f32 %v777_v1, %v785_v7 }
 0x4e6   :  { %v790_v9 = vmul.f32 1.442695, %v787_v8 }
 0x4e8   :  { %2640 = vpow2.f32 %v790_v9 }
 0x4f1   :  { %v2639_v10 = vpop.eup %2638 }
 0x4f2   :  { %v792_v12 = vsel %vm732_vm2, %v2639_v10, 0.0 }
 0x4f3   :  { %793 = vadd.xlane.f32.xlu1 %v792_v12 }
 0x4f5   :  { %v2641_v13 = vpop.eup %2640 }
 0x4f6   :  { %v795_v14 = vsel %vm732_vm2, %v2641_v13, 0.0 }
 0x4f7   :  { %796 = vadd.xlane.f32.xlu1 %v795_v14 }
 0x508   :  { %803 = vrot.lane.b32.xlu1 %v3046_v55, %s2731_s27 }
 0x57c   :  { %v794_v15 = vpop.xlane.xlu1 %793 }
 0x57d   :  { %2642 = vrcp.f32 %v794_v15 }
 0x580   :  { %v797_v17 = vpop.xlane.xlu1 %796 }
 0x581   :  { %2644 = vrcp.f32 %v797_v17 }
 0x584   :  { %v804_v18 = vpop.permute.xlu1 %803 }
 0x585   :  { %2423 = vmatpush3.bf16.msra.mxu1 %v804_v18 }
 0x586   :  { %2428 = vmatprep.subr.bf16.mxu1 %v2726_v29 }
 0x58a   :  { %v2643_v19 = vpop.eup %2642 }
 0x58b   :  { %v800_v21 = vmul.f32 %v2643_v19, %v2639_v10  ;;  %v2214_v10 = vld [vmem:[%s3354_s9] ss:$0 sm:$0xff] }
 0x58e   :  { %v2645_v20 = vpop.eup %2644 }
 0x58f   :  { %v801_v22 = vmul.f32 %v2645_v20, %v2641_v13 }
 0x591   :  { %v802_v24 = vpack.c.bf16 %v801_v22, %v800_v21 }
 0x593   :  { %2425 = vmatmul.mubr.msk.bf16.vlgmr.msra.gmra.mxu1 %vm732_vm2, %v802_v24 }
 0x594   :  { %2429 = vmatpush3.bf16.xpose.msra.mxu1 %v858_v25  ;;  %2430 = vmatprep.mubr.msk.bf16.mxu1 %vm2727_vm1, %v2726_v29 }
 0x595   :  { %2440 = vmatprep.subr.bf16.mxu1 %v2726_v29 }
 0x59b   :  { %2431 = vmatmul.mubr.msk.bf16.vlgmr.msra.gmra.mxu1 %vm732_vm2, %v851_v26 }
 0x59c   :  { %2444 = vmatprep.mubr.msk.bf16.mxu1 %vm2727_vm1, %v2726_v29 }
 0x653   :  { %v843_v27 = vpop.f32.mrf.mxu1 }
 0x655   :  { %v2426_v28 = vpop.f32.mrf.mxu1 }
 0x657   :  { %v846_v30 = vpop.f32.mrf.mxu1 }
 0x659   :  { %v2427_v31 = vpop.f32.mrf.mxu1 }
 0x65a   :  { %v2616_v31 = vld [vmem:[%s3357_s12 + $0x8] sm:$0xff]  }
 0x65b   :  { %v894_v32 = vpop.f32.mrf.mxu1 }
 0x65c   :  { %v895_v33 = vadd.f32 %v894_v32, %v3063_v58  ;;  %v2617_v32 = vld [vmem:[%s3357_s12] sm:$0xff]  }
 0x65d   :  { %v2432_v34 = vpop.f32.mrf.mxu1 }
 0x65e   :  { %v901_v35 = vsel %vm732_vm2, %v895_v33, -inf }
 0x65f   :  { %902 = vmax.xlane.f32.xlu0 %v901_v35  ;;  %v897_v36 = vpop.f32.mrf.mxu1 }
 0x660   :  { %v898_v37 = vadd.f32 %v897_v36, %v3069_v62 }
 0x661   :  { %v2433_v38 = vpop.f32.mrf.mxu1 }
 0x662   :  { %v904_v39 = vsel %vm732_vm2, %v898_v37, -inf }
 0x663   :  { %905 = vmax.xlane.f32.xlu1 %v904_v39 }
 0x6e8   :  { %v903_v40 = vpop.xlane.xlu0 %902 }
 0x6e9   :  { %v907_v41 = vsub.f32 %v895_v33, %v903_v40 }
 0x6eb   :  { %v909_v42 = vmul.f32 1.442695, %v907_v41  ;;  %v2215_v41 = vld [vmem:[%s3355_s10] ss:$0 sm:$0xff] }
 0x6ec   :  { %v906_v43 = vpop.xlane.xlu1 %905 }
 0x6ed   :  { %2646 = vpow2.f32 %v909_v42  ;;  %v908_v44 = vsub.f32 %v898_v37, %v906_v43 }
 0x6ef   :  { %v911_v45 = vmul.f32 1.442695, %v908_v44 }
 0x6f1   :  { %2648 = vpow2.f32 %v911_v45  ;;  %v2216_v45 = vld [vmem:[%s3356_s11] ss:$0 sm:$0xff] }
 0x6fa   :  { %v2647_v46 = vpop.eup %2646 }
 0x6fb   :  { %v913_v47 = vsel %vm732_vm2, %v2647_v46, 0.0 }
 0x6fc   :  { %914 = vadd.xlane.f32.xlu0 %v913_v47 }
 0x6fe   :  { %v2649_v48 = vpop.eup %2648 }
 0x6ff   :  { %v916_v49 = vsel %vm732_vm2, %v2649_v48, 0.0 }
 0x700   :  { %917 = vadd.xlane.f32.xlu0 %v916_v49 }
 0x716   :  { %924 = vrot.lane.b32.xlu0 %v3046_v55, %s2732_s4  ;;  %v2614_v55 = vld [vmem:[%s3353_s8 + $0x8] sm:$0xff]  }
 0x717   :  { %2441 = vmatpush3.bf16.msra.mxu1 %v2614_v55 }
 0x718   :  { %2442 = vmatprep.subr.bf16.mxu1 %v2726_v29 }
 0x71b   :  { %2443 = vmatpush3.bf16.msra.mxu1 %v2615_v60 }
 0x71c   :  { %2456 = vmatprep.subr.bf16.mxu1 %v2726_v29 }
 0x785   :  { %v915_v50 = vpop.xlane.xlu0 %914 }
 0x786   :  { %2650 = vrcp.f32 %v915_v50  ;;  %v2618_v50 = vld [vmem:[%s3359_s14 + $0x18] sm:$0xff]  }
 0x789   :  { %v918_v51 = vpop.xlane.xlu0 %917 }
 0x78a   :  { %2652 = vrcp.f32 %v918_v51  ;;  %v2619_v51 = vld [vmem:[%s3359_s14 + $0x10] sm:$0xff]  }
 0x78d   :  { %v925_v52 = vpop.permute.xlu0 %924 }
 0x78e   :  { %2435 = vmatpush3.bf16.msra.mxu0 %v925_v52  ;;  %v2620_v52 = vld [vmem:[%s3359_s14 + $0x8] sm:$0xff]  }
 0x78f   :  { %2448 = vmatprep.subr.bf16.mxu0 %v2726_v29 }
 0x793   :  { %v2651_v53 = vpop.eup %2650 }
 0x794   :  { %v921_v56 = vmul.f32 %v2651_v53, %v2647_v46  ;;  %v2621_v53 = vld [vmem:[%s3359_s14] sm:$0xff]  }
 0x797   :  { %v2653_v54 = vpop.eup %2652 }
 0x798   :  { %v922_v57 = vmul.f32 %v2653_v54, %v2649_v48  ;;  %v2217_v54 = vld [vmem:[%s3358_s13] ss:$0 sm:$0xff] }
 0x79a   :  { %v923_v59 = vpack.c.bf16 %v922_v57, %v921_v56 }
 0x79c   :  { %2437 = vmatmul.mubr.msk.bf16.vlgmr.msra.gmra.mxu0 %vm732_vm2, %v923_v59 }
 0x79d   :  { %2452 = vmatprep.mubr.msk.bf16.mxu0 %vm2727_vm1, %v2726_v29  ;;  %2449 = vmatpush3.bf16.msra.mxu0 %v2616_v31 }
 0x79e   :  { %2450 = vmatprep.subr.bf16.mxu0 %v2726_v29 }
 0x7a1   :  { %2451 = vmatpush3.bf16.msra.mxu0 %v2617_v32 }
 0x7a2   :  { %2468 = vmatprep.subr.bf16.mxu0 %v2726_v29 }
 0x85c   :  { %v964_v61 = vpop.f32.mrf.mxu0 }
 0x85e   :  { %v2438_v63 = vpop.f32.mrf.mxu0 }
 0x860   :  { %v967_v0 = vpop.f32.mrf.mxu0 }
 0x861   :  { %v2545_v1 = vpack.i.bf16 %v967_v0, %v964_v61 }
 0x862   :  { %v2439_v2 = vpop.f32.mrf.mxu0 }
 0x863   :  { %2546 = vrot.lane.b32.xlu1 %v2545_v1, %s2733_s28 }
 0x8d5   :  { %v2547_v3 = vpop.permute.xlu1 %2546 }
 0x8d6   :  { %v2549_v4 = vunpack.i.h.bf16 %v2547_v3  ;;  %v2548_v5 = vunpack.i.l.bf16 %v2547_v3 }
 0x8d8   :  { %v980_v6 = vsel %vm732_vm2, %v846_v30, %v2549_v4  ;;  %v979_v7 = vsel %vm732_vm2, %v843_v27, %v2548_v5 }
 0x8d9   :  { %v985_v8 = vpack.c.bf16 %v980_v6, %v979_v7 }
 0x8db   :  { %2445 = vmatmul.mubr.msk.bf16.vlgmr.msra.gmra.mxu1 %vm616_vm0, %v985_v8 }
 0x8dc   :  { %2464 = vmatprep.mubr.msk.bf16.mxu1 %vm2727_vm1, %v2726_v29  ;;  %2457 = vmatpush3.bf16.msra.mxu1 %v2618_v50 }
 0x8dd   :  { %2458 = vmatprep.subr.bf16.mxu1 %v2726_v29 }
 0x8e0   :  { %2459 = vmatpush3.bf16.msra.mxu1 %v2619_v51 }
 0x8e1   :  { %2460 = vmatprep.subr.bf16.mxu1 %v2726_v29 }
 0x8e4   :  { %2461 = vmatpush3.bf16.msra.mxu1 %v2620_v52 }
 0x8e5   :  { %2462 = vmatprep.subr.bf16.mxu1 %v2726_v29 }
 0x8e8   :  { %2463 = vmatpush3.bf16.msra.mxu1 %v2621_v53 }
 0x8e9   :  { %2482 = vmatprep.subr.bf16.mxu1 %v2726_v29 }
 0x99b   :  { %v1035_v9 = vpop.f32.mrf.mxu1 }
 0x99c   :  { %v1042_v12 = vadd.f32 %v1035_v9, %v3008_v11 }
 0x99d   :  { %v2446_v13 = vpop.f32.mrf.mxu1 }
 0x99e   :  { %v3117_v14 = vadd.f32 %v2214_v10, %v1042_v12 }
 0x99f   :  { %v1038_v15 = vpop.f32.mrf.mxu1 }
 0x9a0   :  { %v1043_v17 = vadd.f32 %v1038_v15, %v3012_v16  ;;  %v1055_v18 = vsel %vm616_vm0, %v3117_v14, 0.0 }
 0x9a1   :  { %1056 = vadd.xlane.f32.xlu1 %v1055_v18  ;;  %v2447_v19 = vpop.f32.mrf.mxu1 }
 0x9a2   :  { %v3122_v20 = vadd.f32 %v2214_v10, %v1043_v17 }
 0x9a4   :  { %v1058_v21 = vsel %vm616_vm0, %v3122_v20, 0.0 }
 0x9a5   :  { %1059 = vadd.xlane.f32.xlu0 %v1058_v21 }
 0xa2a   :  { %v1057_v22 = vpop.xlane.xlu1 %1056 }
 0xa2b   :  { %v1061_v23 = vmul.f32 0.03125, %v1057_v22 }
 0xa2d   :  { %v1063_v11 = vsub.f32 %v3117_v14, %v1061_v23 }
 0xa2e   :  { %v1060_v24 = vpop.xlane.xlu0 %1059 }
 0xa2f   :  { %v1062_v25 = vmul.f32 0.03125, %v1060_v24  ;;  %v1065_v26 = vmul.f32 %v1063_v11, %v1063_v11 }
 0xa31   :  { %v1064_v16 = vsub.f32 %v3122_v20, %v1062_v25  ;;  %v1067_v27 = vsel %vm616_vm0, %v1065_v26, 0.0 }
 0xa32   :  { %1068 = vadd.xlane.f32.xlu0 %v1067_v27 }
 0xa33   :  { %v1066_v28 = vmul.f32 %v1064_v16, %v1064_v16 }
 0xa35   :  { %v1070_v30 = vsel %vm616_vm0, %v1066_v28, 0.0 }
 0xa36   :  { %1071 = vadd.xlane.f32.xlu1 %v1070_v30 }
 0xabb   :  { %v1069_v33 = vpop.xlane.xlu0 %1068 }
 0xabc   :  { %v1073_v34 = vmul.f32 0.03125, %v1069_v33 }
 0xabe   :  { %v1075_v35 = vadd.f32 1e-12, %v1073_v34 }
 0xabf   :  { %v1072_v36 = vpop.xlane.xlu1 %1071 }
 0xac0   :  { %2654 = vrsqrt.f32 %v1075_v35  ;;  %v1074_v37 = vmul.f32 0.03125, %v1072_v36 }
 0xac2   :  { %v1076_v38 = vadd.f32 1e-12, %v1074_v37 }
 0xac4   :  { %2656 = vrsqrt.f32 %v1076_v38 }
 0xacd   :  { %v2655_v39 = vpop.eup %2654 }
 0xace   :  { %v1079_v40 = vmul.f32 %v2655_v39, %v1063_v11 }
 0xad0   :  { %v1087_v44 = vmul.f32 %v2215_v41, %v1079_v40 }
 0xad1   :  { %v2657_v42 = vpop.eup %2656 }
 0xad2   :  { %v1080_v43 = vmul.f32 %v2657_v42, %v1064_v16  ;;  %v1095_v47 = vadd.f32 %v2216_v45, %v1087_v44 }
 0xad4   :  { %v1088_v46 = vmul.f32 %v2215_v41, %v1080_v43 }
 0xad6   :  { %v1096_v48 = vadd.f32 %v2216_v45, %v1088_v46 }
 0xad8   :  { %v1101_v49 = vpack.c.bf16 %v1096_v48, %v1095_v47 }
 0xada   :  { %2453 = vmatmul.mubr.msk.bf16.vlgmr.msra.gmra.mxu0 %vm616_vm0, %v1101_v49 }
 0xadb   :  { %2472 = vmatprep.mubr.msk.bf16.mxu0 %vm2727_vm1, %v2726_v29 }
 0xb9a   :  { %v1158_v56 = vpop.f32.mrf.mxu0 }
 0xb9b   :  { %v1159_v57 = vadd.f32 %v2217_v54, %v1158_v56 }
 0xb9c   :  { %v2454_v59 = vpop.f32.mrf.mxu0 }
 0xb9d   :  { %v1167_v55 = vmul.f32 0.70710677, %v1159_v57  ;;  %v1165_v47 = vmul.f32 0.5, %v1159_v57 }
 0xb9e   :  { %v1161_v60 = vpop.f32.mrf.mxu0 }
 0xb9f   :  { %v1169_v61 = vand.u32 2147483647, %v1167_v55  ;;  %v1162_v63 = vadd.f32 %v2217_v54, %v1161_v60  ;;  %vm1209_vm3 = vcmp.ge.f32.partialorder %v1167_v55, 0.0  ;;  %v2230_v54 = vld [vmem:[%s3360_s15] ss:$0 sm:$0xff] }
 0xba0   :  { %v2455_v0 = vpop.f32.mrf.mxu0 }
 0xba1   :  { %v1171_v1 = vmul.f32 0.3275911, %v1169_v61  ;;  %v1168_v2 = vmul.f32 0.70710677, %v1162_v63  ;;  %v1197_v7 = vsub.f32 0.0, %v1169_v61  ;;  %v1166_v48 = vmul.f32 0.5, %v1162_v63 }
 0xba3   :  { %v1173_v3 = vadd.f32 1.0, %v1171_v1  ;;  %v1170_v4 = vand.u32 2147483647, %v1168_v2  ;;  %v1199_v8 = vmul.f32 %v1197_v7, %v1169_v61  ;;  %vm1210_vm4 = vcmp.ge.f32.partialorder %v1168_v2, 0.0 }
 0xba5   :  { %2658 = vrcp.f32 %v1173_v3  ;;  %v1172_v5 = vmul.f32 0.3275911, %v1170_v4  ;;  %v1198_v9 = vsub.f32 0.0, %v1170_v4  ;;  %v1201_v13 = vmul.f32 1.442695, %v1199_v8 }
 0xba7   :  { %v1174_v6 = vadd.f32 1.0, %v1172_v5  ;;  %v1200_v15 = vmul.f32 %v1198_v9, %v1170_v4 }
 0xba9   :  { %2660 = vrcp.f32 %v1174_v6  ;;  %v1203_v22 = vmul.f32 1.442695, %v1200_v15 }
 0xbaa   :  { %2662 = vpow2.f32 %v1201_v13 }
 0xbab   :  { %2664 = vpow2.f32 %v1203_v22 }
 0xbb2   :  { %v2659_v10 = vpop.eup %2658 }
 0xbb3   :  { %v1179_v12 = vmul.f32 1.0614054, %v2659_v10 }
 0xbb5   :  { %v2221_v17 = vadd.f32 -1.4531521, %v1179_v12  ;;  %v2623_v12 = vld [vmem:[%s3351_s6 + $0x10] sm:$0xff]  }
 0xbb6   :  { %v2661_v18 = vpop.eup %2660 }
 0xbb7   :  { %v1183_v19 = vmul.f32 %v2659_v10, %v2221_v17  ;;  %v1180_v21 = vmul.f32 1.0614054, %v2661_v18  ;;  %v2663_v34 = vpop.eup %2662 }
 0xbb8   :  { %v2665_v39 = vpop.eup %2664 }
 0xbb9   :  { %v1185_v23 = vadd.f32 1.4214138, %v1183_v19  ;;  %v2222_v11 = vadd.f32 -1.4531521, %v1180_v21 }
 0xbbb   :  { %v1187_v24 = vmul.f32 %v2659_v10, %v1185_v23  ;;  %v1184_v25 = vmul.f32 %v2661_v18, %v2222_v11  ;;  %v2233_v11 = vld [vmem:[%s3379_s29 + $0x1] ss:$0 sm:$0xff] }
 0xbbd   :  { %v2223_v26 = vadd.f32 -0.28449672, %v1187_v24  ;;  %v1186_v16 = vadd.f32 1.4214138, %v1184_v25 }
 0xbbf   :  { %v1191_v27 = vmul.f32 %v2659_v10, %v2223_v26  ;;  %v1188_v28 = vmul.f32 %v2661_v18, %v1186_v16  ;;  %v2234_v16 = vld [vmem:[%s3350_s5 + $0x1] ss:$0 sm:$0xff] }
 0xbc1   :  { %v1193_v30 = vadd.f32 0.2548296, %v1191_v27  ;;  %v2224_v31 = vadd.f32 -0.28449672, %v1188_v28 }
 0xbc3   :  { %v1195_v32 = vmul.f32 %v2659_v10, %v1193_v30  ;;  %v1192_v33 = vmul.f32 %v2661_v18, %v2224_v31  ;;  %v2622_v10 = vld [vmem:[%s3351_s6 + $0x18] sm:$0xff]  }
 0xbc4   :  { %2469 = vmatpush3.bf16.msra.mxu0 %v2622_v10 }
 0xbc5   :  { %v1205_v35 = vmul.f32 %v2663_v34, %v1195_v32  ;;  %v1194_v36 = vadd.f32 0.2548296, %v1192_v33  ;;  %2470 = vmatprep.subr.bf16.mxu0 %v2726_v29  ;;  %v2240_v33 = vld [vmem:[%s3352_s7 + $0x1] ss:$0 sm:$0xff] }
 0xbc7   :  { %v1207_v37 = vsub.f32 1.0, %v1205_v35  ;;  %v1196_v38 = vmul.f32 %v2661_v18, %v1194_v36 }
 0xbc8   :  { %2471 = vmatpush3.bf16.msra.mxu0 %v2623_v12 }
 0xbc9   :  { %v1211_v40 = vsub.f32 0.0, %v1207_v37  ;;  %v1206_v41 = vmul.f32 %v2665_v39, %v1196_v38  ;;  %2476 = vmatprep.subr.bf16.mxu0 %v2726_v29 }
 0xbcb   :  { %v1213_v42 = vsel %vm1209_vm3, %v1207_v37, %v1211_v40  ;;  %v1208_v43 = vsub.f32 1.0, %v1206_v41 }
 0xbcc   :  { %v1215_v45 = vadd.f32 1.0, %v1213_v42 }
 0xbcd   :  { %v1212_v44 = vsub.f32 0.0, %v1208_v43 }
 0xbce   :  { %v1217_v50 = vmul.f32 %v1215_v45, %v1165_v47 }
 0xbcf   :  { %v1214_v46 = vsel %vm1210_vm4, %v1208_v43, %v1212_v44 }
 0xbd0   :  { %v1216_v49 = vadd.f32 1.0, %v1214_v46 }
 0xbd2   :  { %v1218_v51 = vmul.f32 %v1216_v49, %v1166_v48 }
 0xbd4   :  { %v1227_v52 = vpack.c.bf16 %v1218_v51, %v1217_v50 }
 0xbd6   :  { %2465 = vmatmul.mubr.msk.bf16.vlgmr.msra.gmra.mxu1 %vm1252_vm5, %v1227_v52 }
 0xbd7   :  { %2484 = vmatprep.mubr.msk.bf16.mxu1 %vm2727_vm1, %v2726_v29 }
 0xc96   :  { %v1290_v53 = vpop.f32.mrf.mxu1 }
 0xc97   :  { %v1297_v56 = vadd.f32 %v1290_v53, %v3117_v14 }
 0xc98   :  { %v2466_v59 = vpop.f32.mrf.mxu1 }
 0xc99   :  { %v3173_v57 = vadd.f32 %v2230_v54, %v1297_v56 }
 0xc9a   :  { %v1293_v55 = vpop.f32.mrf.mxu1 }
 0xc9b   :  { %v1298_v60 = vadd.f32 %v1293_v55, %v3122_v20  ;;  %v1312_v61 = vsel %vm616_vm0, %v3173_v57, 0.0 }
 0xc9c   :  { %1313 = vadd.xlane.f32.xlu0 %v1312_v61  ;;  %v2467_v63 = vpop.f32.mrf.mxu1 }
 0xc9d   :  { %v3178_v0 = vadd.f32 %v2230_v54, %v1298_v60 }
 0xc9f   :  { %v1315_v1 = vsel %vm616_vm0, %v3178_v0, 0.0 }
 0xca0   :  { %1316 = vadd.xlane.f32.xlu1 %v1315_v1 }
 0xd25   :  { %v1314_v2 = vpop.xlane.xlu0 %1313 }
 0xd26   :  { %v1318_v3 = vmul.f32 0.03125, %v1314_v2 }
 0xd28   :  { %v1320_v14 = vsub.f32 %v3173_v57, %v1318_v3 }
 0xd29   :  { %v1317_v4 = vpop.xlane.xlu1 %1316 }
 0xd2a   :  { %v1319_v5 = vmul.f32 0.03125, %v1317_v4  ;;  %v1322_v6 = vmul.f32 %v1320_v14, %v1320_v14 }
 0xd2c   :  { %v1321_v20 = vsub.f32 %v3178_v0, %v1319_v5  ;;  %v1324_v7 = vsel %vm616_vm0, %v1322_v6, 0.0 }
 0xd2d   :  { %1325 = vadd.xlane.f32.xlu0 %v1324_v7 }
 0xd2e   :  { %v1323_v8 = vmul.f32 %v1321_v20, %v1321_v20 }
 0xd30   :  { %v1327_v9 = vsel %vm616_vm0, %v1323_v8, 0.0 }
 0xd31   :  { %1328 = vadd.xlane.f32.xlu1 %v1327_v9 }
 0xdb6   :  { %v1326_v13 = vpop.xlane.xlu0 %1325 }
 0xdb7   :  { %v1330_v15 = vmul.f32 0.03125, %v1326_v13 }
 0xdb9   :  { %v1332_v17 = vadd.f32 1e-12, %v1330_v15 }
 0xdba   :  { %v1329_v18 = vpop.xlane.xlu1 %1328 }
 0xdbb   :  { %2666 = vrsqrt.f32 %v1332_v17  ;;  %v1331_v19 = vmul.f32 0.03125, %v1329_v18 }
 0xdbd   :  { %v1333_v21 = vadd.f32 1e-12, %v1331_v19 }
 0xdbf   :  { %2668 = vrsqrt.f32 %v1333_v21 }
 0xdc8   :  { %v2667_v22 = vpop.eup %2666 }
 0xdc9   :  { %v1336_v23 = vmul.f32 %v2667_v22, %v1320_v14 }
 0xdcb   :  { %v1344_v26 = vmul.f32 %v2233_v11, %v1336_v23 }
 0xdcc   :  { %v2669_v24 = vpop.eup %2668 }
 0xdcd   :  { %v1337_v25 = vmul.f32 %v2669_v24, %v1321_v20  ;;  %v1352_v28 = vadd.f32 %v2234_v16, %v1344_v26 }
 0xdcf   :  { %v1345_v27 = vmul.f32 %v2233_v11, %v1337_v25 }
 0xdd1   :  { %v1353_v30 = vadd.f32 %v2234_v16, %v1345_v27 }
 0xdd3   :  { %v1359_v31 = vpack.c.bf16 %v1353_v30, %v1352_v28 }
 0xdd5   :  { %2473 = vmatmul.mubr.msk.bf16.vlgmr.msra.gmra.mxu0 %vm616_vm0, %v1359_v31 }
 0xdd6   :  { %2478 = vmatprep.mubr.msk.bf16.mxu0 %vm2727_vm1, %v2726_v29 }
 0xe95   :  { %v1417_v32 = vpop.f32.mrf.mxu0 }
 0xe96   :  { %v1418_v36 = vadd.f32 %v2240_v33, %v1417_v32 }
 0xe97   :  { %v2474_v34 = vpop.f32.mrf.mxu0 }
 0xe99   :  { %v1420_v35 = vpop.f32.mrf.mxu0 }
 0xe9a   :  { %v1421_v37 = vadd.f32 %v2240_v33, %v1420_v35 }
 0xe9b   :  { %v2475_v38 = vpop.f32.mrf.mxu0 }
 0xe9c   :  { %v3206_v39 = vpack.c.bf16 %v1421_v37, %v1418_v36  ;;  %v2624_v36 = vld [vmem:[%s3353_s8 + $0x18] sm:$0xff]  }
 0xe9e   :  { %1547 = vrot.lane.b32.xlu1 %v3206_v39, %s2729_s24  ;;  %1426 = vrot.lane.b32.xlu0 %v3206_v39, %s2728_s22 }
 0xea2   :  { %1545 = vrot.lane.b32.xlu1 %v3206_v39, %s2730_s23 }
 0xf10   :  { %v1427_v40 = vpop.permute.xlu0 %1426  ;;  %v1548_v42 = vpop.permute.xlu1 %1547 }
 0xf11   :  { %v1432_v41 = vsel %vm732_vm2, %v1427_v40, 0  ;;  %v1553_v43 = vsel %vm732_vm2, %v1548_v42, 0 }
 0xf12   :  { %2477 = vmatpush3.bf16.xpose.msra.mxu0 %v1432_v41 }
 0xf13   :  { %2488 = vmatprep.subr.bf16.mxu0 %v2726_v29 }
 0xf14   :  { %v1546_v44 = vpop.permute.xlu1 %1545 }
 0xf19   :  { %2479 = vmatmul.mubr.msk.bf16.vlgmr.msra.gmra.mxu0 %vm732_vm2, %v3206_v39 }
 0xf1a   :  { %2489 = vmatpush3.bf16.xpose.msra.mxu0 %v1553_v43  ;;  %2490 = vmatprep.mubr.msk.bf16.mxu0 %vm2727_vm1, %v2726_v29 }
 0xf1b   :  { %2500 = vmatprep.subr.bf16.mxu0 %v2726_v29 }
 0xf21   :  { %2491 = vmatmul.mubr.msk.bf16.vlgmr.msra.gmra.mxu0 %vm732_vm2, %v1546_v44 }
 0xf22   :  { %2504 = vmatprep.mubr.msk.bf16.mxu0 %vm2727_vm1, %v2726_v29  ;;  %2501 = vmatpush3.bf16.msra.mxu0 %v2624_v36 }
 0xf23   :  { %2502 = vmatprep.subr.bf16.mxu0 %v2726_v29 }
 0xfd9   :  { %v1468_v45 = vpop.f32.mrf.mxu0 }
 0xfda   :  { %v1469_v46 = vadd.f32 %v1468_v45, %v3063_v58 }
 0xfdb   :  { %v2480_v47 = vpop.f32.mrf.mxu0 }
 0xfdc   :  { %v1475_v48 = vsel %vm732_vm2, %v1469_v46, -inf }
 0xfdd   :  { %1476 = vmax.xlane.f32.xlu1 %v1475_v48  ;;  %v1471_v49 = vpop.f32.mrf.mxu0 }
 0xfde   :  { %v1472_v50 = vadd.f32 %v1471_v49, %v3069_v62 }
 0xfdf   :  { %v2481_v51 = vpop.f32.mrf.mxu0 }
 0xfe0   :  { %v1478_v52 = vsel %vm732_vm2, %v1472_v50, -inf }
 0xfe1   :  { %1479 = vmax.xlane.f32.xlu0 %v1478_v52  ;;  %v1589_v53 = vpop.f32.mrf.mxu0 }
 0xfe2   :  { %v1590_v54 = vadd.f32 %v1589_v53, %v3063_v58 }
 0xfe3   :  { %v2492_v56 = vpop.f32.mrf.mxu0 }
 0xfe4   :  { %v1596_v59 = vsel %vm732_vm2, %v1590_v54, -inf }
 0xfe5   :  { %1597 = vmax.xlane.f32.xlu0 %v1596_v59  ;;  %v1592_v55 = vpop.f32.mrf.mxu0 }
 0xfe6   :  { %v1593_v60 = vadd.f32 %v1592_v55, %v3069_v62 }
 0xfe7   :  { %v2493_v61 = vpop.f32.mrf.mxu0 }
 0xfe8   :  { %v1599_v63 = vsel %vm732_vm2, %v1593_v60, -inf }
 0xfe9   :  { %1600 = vmax.xlane.f32.xlu0 %v1599_v63 }
0x1066   :  { %v1477_v1 = vpop.xlane.xlu1 %1476 }
0x1067   :  { %v1481_v2 = vsub.f32 %v1469_v46, %v1477_v1 }
0x1069   :  { %v1483_v3 = vmul.f32 1.442695, %v1481_v2 }
0x106a   :  { %v1480_v14 = vpop.xlane.xlu0 %1479 }
0x106b   :  { %2670 = vpow2.f32 %v1483_v3  ;;  %v1482_v4 = vsub.f32 %v1472_v50, %v1480_v14 }
0x106d   :  { %v1485_v5 = vmul.f32 1.442695, %v1482_v4 }
0x106e   :  { %v1598_v6 = vpop.xlane.xlu0 %1597 }
0x106f   :  { %2672 = vpow2.f32 %v1485_v5  ;;  %v1602_v58 = vsub.f32 %v1590_v54, %v1598_v6  ;;  %v2256_v54 = vld [vmem:[%s3354_s9 + $0x1] ss:$0 sm:$0xff] }
0x1071   :  { %v1604_v20 = vmul.f32 1.442695, %v1602_v58 }
0x1072   :  { %v1601_v7 = vpop.xlane.xlu0 %1600 }
0x1073   :  { %2674 = vpow2.f32 %v1604_v20  ;;  %v1603_v8 = vsub.f32 %v1593_v60, %v1601_v7 }
0x1075   :  { %v1606_v9 = vmul.f32 1.442695, %v1603_v8 }
0x1077   :  { %2676 = vpow2.f32 %v1606_v9  ;;  %v2626_v9 = vld [vmem:[%s3357_s12 + $0x18] sm:$0xff]  }
0x1078   :  { %v2671_v62 = vpop.eup %2670 }
0x1079   :  { %v1487_v10 = vsel %vm732_vm2, %v2671_v62, 0.0 }
0x107a   :  { %1488 = vadd.xlane.f32.xlu1 %v1487_v10 }
0x107c   :  { %v2673_v12 = vpop.eup %2672 }
0x107d   :  { %v1490_v13 = vsel %vm732_vm2, %v2673_v12, 0.0 }
0x107e   :  { %1491 = vadd.xlane.f32.xlu0 %v1490_v13 }
0x1080   :  { %v2675_v15 = vpop.eup %2674 }
0x1081   :  { %v1608_v17 = vsel %vm732_vm2, %v2675_v15, 0.0 }
0x1082   :  { %1609 = vadd.xlane.f32.xlu1 %v1608_v17 }
0x1084   :  { %v2677_v18 = vpop.eup %2676 }
0x1085   :  { %v1611_v19 = vsel %vm732_vm2, %v2677_v18, 0.0 }
0x1086   :  { %1612 = vadd.xlane.f32.xlu0 %v1611_v19 }
0x1093   :  { %1498 = vrot.lane.b32.xlu1 %v3206_v39, %s2731_s27 }
0x109c   :  { %1619 = vrot.lane.b32.xlu0 %v3206_v39, %s2732_s4  ;;  %v2625_v39 = vld [vmem:[%s3353_s8 + $0x10] sm:$0xff]  }
0x109d   :  { %2503 = vmatpush3.bf16.msra.mxu0 %v2625_v39 }
0x109e   :  { %2516 = vmatprep.subr.bf16.mxu0 %v2726_v29 }
0x1103   :  { %v1489_v21 = vpop.xlane.xlu1 %1488 }
0x1104   :  { %2678 = vrcp.f32 %v1489_v21 }
0x1107   :  { %v1492_v22 = vpop.xlane.xlu0 %1491 }
0x1108   :  { %2680 = vrcp.f32 %v1492_v22  ;;  %v2259_v22 = vld [vmem:[%s3355_s10 + $0x1] ss:$0 sm:$0xff] }
0x110b   :  { %v1610_v23 = vpop.xlane.xlu1 %1609 }
0x110c   :  { %2682 = vrcp.f32 %v1610_v23 }
0x110f   :  { %v1499_v11 = vpop.permute.xlu1 %1498  ;;  %v1613_v24 = vpop.xlane.xlu0 %1612 }
0x1110   :  { %2684 = vrcp.f32 %v1613_v24  ;;  %2483 = vmatpush3.bf16.msra.mxu1 %v1499_v11 }
0x1111   :  { %2494 = vmatprep.subr.bf16.mxu1 %v2726_v29  ;;  %v2679_v25 = vpop.eup %2678 }
0x1112   :  { %v1495_v16 = vmul.f32 %v2679_v25, %v2671_v62  ;;  %v2627_v62 = vld [vmem:[%s3357_s12 + $0x10] sm:$0xff]   ;;  %v2260_v25 = vld [vmem:[%s3356_s11 + $0x1] ss:$0 sm:$0xff] }
0x1113   :  { %v1620_v30 = vpop.permute.xlu0 %1619 }
0x1115   :  { %v2681_v26 = vpop.eup %2680 }
0x1116   :  { %v1496_v27 = vmul.f32 %v2681_v26, %v2673_v12 }
0x1118   :  { %v1497_v28 = vpack.c.bf16 %v1496_v27, %v1495_v16 }
0x1119   :  { %v2683_v31 = vpop.eup %2682 }
0x111a   :  { %2485 = vmatmul.mubr.msk.bf16.vlgmr.msra.gmra.mxu1 %vm732_vm2, %v1497_v28  ;;  %v1616_v33 = vmul.f32 %v2683_v31, %v2675_v15  ;;  %v2629_v31 = vld [vmem:[%s3359_s14 + $0x30] sm:$0xff]  }
0x111b   :  { %2495 = vmatpush3.bf16.msra.mxu1 %v1620_v30  ;;  %2496 = vmatprep.mubr.msk.bf16.mxu1 %vm2727_vm1, %v2726_v29  ;;  %v2628_v30 = vld [vmem:[%s3359_s14 + $0x38] sm:$0xff]  }
0x111c   :  { %2508 = vmatprep.subr.bf16.mxu1 %v2726_v29 }
0x111d   :  { %v2685_v32 = vpop.eup %2684 }
0x111e   :  { %v1617_v34 = vmul.f32 %v2685_v32, %v2677_v18  ;;  %v2630_v32 = vld [vmem:[%s3359_s14 + $0x28] sm:$0xff]  }
0x1120   :  { %v1618_v35 = vpack.c.bf16 %v1617_v34, %v1616_v33  ;;  %v2631_v33 = vld [vmem:[%s3359_s14 + $0x20] sm:$0xff]  }
0x1121   :  { %v2266_v34 = vld [vmem:[%s3358_s13 + $0x1] ss:$0 sm:$0xff] }
0x1122   :  { %2497 = vmatmul.mubr.msk.bf16.vlgmr.msra.gmra.mxu1 %vm732_vm2, %v1618_v35 }
0x1123   :  { %2512 = vmatprep.mubr.msk.bf16.mxu1 %vm2727_vm1, %v2726_v29  ;;  %2509 = vmatpush3.bf16.msra.mxu1 %v2626_v9 }
0x1124   :  { %2510 = vmatprep.subr.bf16.mxu1 %v2726_v29 }
0x1127   :  { %2511 = vmatpush3.bf16.msra.mxu1 %v2627_v62 }
0x1128   :  { %2528 = vmatprep.subr.bf16.mxu1 %v2726_v29 }
0x11da   :  { %v1538_v37 = vpop.f32.mrf.mxu1 }
0x11dc   :  { %v2486_v38 = vpop.f32.mrf.mxu1 }
0x11de   :  { %v1541_v40 = vpop.f32.mrf.mxu1 }
0x11e0   :  { %v2487_v41 = vpop.f32.mrf.mxu1 }
0x11e2   :  { %v1659_v42 = vpop.f32.mrf.mxu1 }
0x11e4   :  { %v2498_v43 = vpop.f32.mrf.mxu1 }
0x11e6   :  { %v1662_v44 = vpop.f32.mrf.mxu1 }
0x11e7   :  { %v2550_v45 = vpack.i.bf16 %v1662_v44, %v1659_v42 }
0x11e8   :  { %v2499_v46 = vpop.f32.mrf.mxu1 }
0x11e9   :  { %2551 = vrot.lane.b32.xlu1 %v2550_v45, %s2733_s28 }
0x125b   :  { %v2552_v47 = vpop.permute.xlu1 %2551 }
0x125c   :  { %v2554_v48 = vunpack.i.h.bf16 %v2552_v47  ;;  %v2553_v49 = vunpack.i.l.bf16 %v2552_v47 }
0x125e   :  { %v1675_v50 = vsel %vm732_vm2, %v1541_v40, %v2554_v48  ;;  %v1674_v51 = vsel %vm732_vm2, %v1538_v37, %v2553_v49 }
0x125f   :  { %v1681_v52 = vpack.c.bf16 %v1675_v50, %v1674_v51 }
0x1261   :  { %2505 = vmatmul.mubr.msk.bf16.vlgmr.msra.gmra.mxu0 %vm616_vm0, %v1681_v52 }
0x1262   :  { %2524 = vmatprep.mubr.msk.bf16.mxu0 %vm2727_vm1, %v2726_v29  ;;  %2517 = vmatpush3.bf16.msra.mxu0 %v2628_v30 }
0x1263   :  { %2518 = vmatprep.subr.bf16.mxu0 %v2726_v29 }
0x1266   :  { %2519 = vmatpush3.bf16.msra.mxu0 %v2629_v31 }
0x1267   :  { %2520 = vmatprep.subr.bf16.mxu0 %v2726_v29 }
0x126a   :  { %2521 = vmatpush3.bf16.msra.mxu0 %v2630_v32  ;;  %v2288_v32 = vld [vmem:[%s3360_s15 + $0x1] ss:$0 sm:$0xff] }
0x126b   :  { %2522 = vmatprep.subr.bf16.mxu0 %v2726_v29 }
0x126e   :  { %2523 = vmatpush3.bf16.msra.mxu0 %v2631_v33 }
0x1321   :  { %v1731_v53 = vpop.f32.mrf.mxu0 }
0x1322   :  { %v1738_v56 = vadd.f32 %v1731_v53, %v3173_v57 }
0x1323   :  { %v2506_v59 = vpop.f32.mrf.mxu0 }
0x1324   :  { %v3267_v55 = vadd.f32 %v2256_v54, %v1738_v56 }
0x1325   :  { %v1734_v60 = vpop.f32.mrf.mxu0 }
0x1326   :  { %v1739_v61 = vadd.f32 %v1734_v60, %v3178_v0  ;;  %v1754_v63 = vsel %vm616_vm0, %v3267_v55, 0.0 }
0x1327   :  { %1755 = vadd.xlane.f32.xlu1 %v1754_v63  ;;  %v2507_v1 = vpop.f32.mrf.mxu0 }
0x1328   :  { %v3272_v2 = vadd.f32 %v2256_v54, %v1739_v61 }
0x132a   :  { %v1757_v3 = vsel %vm616_vm0, %v3272_v2, 0.0 }
0x132b   :  { %1758 = vadd.xlane.f32.xlu0 %v1757_v3 }
0x13b0   :  { %v1756_v14 = vpop.xlane.xlu1 %1755 }
0x13b1   :  { %v1760_v4 = vmul.f32 0.03125, %v1756_v14 }
0x13b3   :  { %v1762_v57 = vsub.f32 %v3267_v55, %v1760_v4 }
0x13b4   :  { %v1759_v5 = vpop.xlane.xlu0 %1758 }
0x13b5   :  { %v1761_v6 = vmul.f32 0.03125, %v1759_v5  ;;  %v1764_v58 = vmul.f32 %v1762_v57, %v1762_v57 }
0x13b7   :  { %v1763_v0 = vsub.f32 %v3272_v2, %v1761_v6  ;;  %v1766_v20 = vsel %vm616_vm0, %v1764_v58, 0.0 }
0x13b8   :  { %1767 = vadd.xlane.f32.xlu0 %v1766_v20 }
0x13b9   :  { %v1765_v7 = vmul.f32 %v1763_v0, %v1763_v0 }
0x13bb   :  { %v1769_v8 = vsel %vm616_vm0, %v1765_v7, 0.0 }
0x13bc   :  { %1770 = vadd.xlane.f32.xlu1 %v1769_v8 }
0x1441   :  { %v1768_v10 = vpop.xlane.xlu0 %1767 }
0x1442   :  { %v1772_v12 = vmul.f32 0.03125, %v1768_v10 }
0x1444   :  { %v1774_v13 = vadd.f32 1e-12, %v1772_v12 }
0x1445   :  { %v1771_v15 = vpop.xlane.xlu1 %1770 }
0x1446   :  { %2686 = vrsqrt.f32 %v1774_v13  ;;  %v1773_v17 = vmul.f32 0.03125, %v1771_v15 }
0x1448   :  { %v1775_v18 = vadd.f32 1e-12, %v1773_v17 }
0x144a   :  { %2688 = vrsqrt.f32 %v1775_v18 }
0x1453   :  { %v2687_v19 = vpop.eup %2686 }
0x1454   :  { %v1778_v21 = vmul.f32 %v2687_v19, %v1762_v57 }
0x1456   :  { %v1786_v24 = vmul.f32 %v2259_v22, %v1778_v21 }
0x1457   :  { %v2689_v23 = vpop.eup %2688 }
0x1458   :  { %v1779_v11 = vmul.f32 %v2689_v23, %v1763_v0  ;;  %v1794_v16 = vadd.f32 %v2260_v25, %v1786_v24 }
0x145a   :  { %v1787_v26 = vmul.f32 %v2259_v22, %v1779_v11 }
0x145c   :  { %v1795_v27 = vadd.f32 %v2260_v25, %v1787_v26 }
0x145e   :  { %v1801_v28 = vpack.c.bf16 %v1795_v27, %v1794_v16 }
0x1460   :  { %2513 = vmatmul.mubr.msk.bf16.vlgmr.msra.gmra.mxu1 %vm616_vm0, %v1801_v28 }
0x1461   :  { %2532 = vmatprep.mubr.msk.bf16.mxu1 %vm2727_vm1, %v2726_v29 }
0x1520   :  { %v1859_v35 = vpop.f32.mrf.mxu1 }
0x1521   :  { %v1860_v36 = vadd.f32 %v2266_v34, %v1859_v35 }
0x1522   :  { %v2514_v37 = vpop.f32.mrf.mxu1 }
0x1523   :  { %v1868_v38 = vmul.f32 0.70710677, %v1860_v36  ;;  %v1866_v25 = vmul.f32 0.5, %v1860_v36 }
0x1524   :  { %v1862_v39 = vpop.f32.mrf.mxu1 }
0x1525   :  { %v1870_v40 = vand.u32 2147483647, %v1868_v38  ;;  %v1863_v41 = vadd.f32 %v2266_v34, %v1862_v39  ;;  %vm1910_vm6 = vcmp.ge.f32.partialorder %v1868_v38, 0.0 }
0x1526   :  { %v2515_v42 = vpop.f32.mrf.mxu1 }
0x1527   :  { %v1872_v43 = vmul.f32 0.3275911, %v1870_v40  ;;  %v1869_v44 = vmul.f32 0.70710677, %v1863_v41  ;;  %v1898_v49 = vsub.f32 0.0, %v1870_v40  ;;  %v1867_v26 = vmul.f32 0.5, %v1863_v41 }
0x1529   :  { %v1874_v45 = vadd.f32 1.0, %v1872_v43  ;;  %v1871_v46 = vand.u32 2147483647, %v1869_v44  ;;  %v1900_v50 = vmul.f32 %v1898_v49, %v1870_v40  ;;  %vm1911_vm7 = vcmp.ge.f32.partialorder %v1869_v44, 0.0 }
0x152b   :  { %2690 = vrcp.f32 %v1874_v45  ;;  %v1873_v47 = vmul.f32 0.3275911, %v1871_v46  ;;  %v1899_v51 = vsub.f32 0.0, %v1871_v46  ;;  %v1902_v54 = vmul.f32 1.442695, %v1900_v50  ;;  %v2632_v50 = vld [vmem:[%s3363_s18 + $0x8] sm:$0xff]  }
0x152c   :  { %2529 = vmatpush3.bf16.msra.mxu1 %v2632_v50 }
0x152d   :  { %v1875_v48 = vadd.f32 1.0, %v1873_v47  ;;  %v1901_v56 = vmul.f32 %v1899_v51, %v1871_v46  ;;  %v2633_v51 = vld [vmem:[%s3363_s18] sm:$0xff]   ;;  %2530 = vmatprep.subr.bf16.mxu1 %v2726_v29 }
0x152e   :  { %v2290_v29 = vld [vmem:[%s3362_s17] ss:$0 sm:$0xff]  ;;  %s2734_s17 = smov [#allocation2]  }
0x152f   :  { %2692 = vrcp.f32 %v1875_v48  ;;  %v1904_v1 = vmul.f32 1.442695, %v1901_v56  ;;  %s2139_s27 = sshll.u32 %s2734_s17, 4  ;;  %s2140_s27 = int_to_ptr.vmem [resolvable:$true] %s2139_s27 }
0x1530   :  { %2694 = vpow2.f32 %v1902_v54  ;;  %2531 = vmatpush3.bf16.msra.mxu1 %v2633_v51  ;;  %s2704_s4 = scalar_lea.vmem %s2140_s27, 32  ;;  %p2709_p1 = scmp.lt.s32.totalorder %s2140_s27, %s2140_s27 }
0x1531   :  { %2696 = vpow2.f32 %v1904_v1  ;;  %p2705_p0 = scmp.ne.s32.totalorder %s2140_s27, %s2704_s4  ;;  %p2710_p2 = scmp.lt.s32.totalorder %s2704_s4, %s2704_s4 }
0x1533   :  { %p2711_p3 = por %p2710_p2, %p2709_p1 }
0x1535   :  { %p2712_p4 = pnand %p2711_p3, %p2705_p0 }
0x1538   :  { %v2691_v52 = vpop.eup %2690 }
0x1539   :  { %v1880_v53 = vmul.f32 1.0614054, %v2691_v52 }
0x153b   :  { %v2270_v59 = vadd.f32 -1.4531521, %v1880_v53 }
0x153c   :  { %v2693_v60 = vpop.eup %2692 }
0x153d   :  { %v1884_v61 = vmul.f32 %v2691_v52, %v2270_v59  ;;  %v1881_v63 = vmul.f32 1.0614054, %v2693_v60  ;;  %v2695_v62 = vpop.eup %2694 }
0x153e   :  { %v2697_v17 = vpop.eup %2696 }
0x153f   :  { %v1886_v3 = vadd.f32 1.4214138, %v1884_v61  ;;  %v2271_v14 = vadd.f32 -1.4531521, %v1881_v63  ;;  %v2289_v63 = vld [vmem:[%s3361_s16] ss:$0 sm:$0xff] }
0x1541   :  { %v1888_v4 = vmul.f32 %v2691_v52, %v1886_v3  ;;  %v1885_v57 = vmul.f32 %v2693_v60, %v2271_v14 }
0x1543   :  { %v2272_v5 = vadd.f32 -0.28449672, %v1888_v4  ;;  %v1887_v6 = vadd.f32 1.4214138, %v1885_v57 }
0x1545   :  { %v1892_v58 = vmul.f32 %v2691_v52, %v2272_v5  ;;  %v1889_v0 = vmul.f32 %v2693_v60, %v1887_v6 }
0x1547   :  { %v1894_v20 = vadd.f32 0.2548296, %v1892_v58  ;;  %v2273_v7 = vadd.f32 -0.28449672, %v1889_v0 }
0x1549   :  { %v1896_v8 = vmul.f32 %v2691_v52, %v1894_v20  ;;  %v1893_v9 = vmul.f32 %v2693_v60, %v2273_v7 }
0x154b   :  { %v1906_v10 = vmul.f32 %v2695_v62, %v1896_v8  ;;  %v1895_v12 = vadd.f32 0.2548296, %v1893_v9 }
0x154d   :  { %v1908_v13 = vsub.f32 1.0, %v1906_v10  ;;  %v1897_v15 = vmul.f32 %v2693_v60, %v1895_v12  ;;  %v2291_v10 = vld [vmem:[%s3364_s19] ss:$0 sm:$0xff] }
0x154f   :  { %v1912_v18 = vsub.f32 0.0, %v1908_v13  ;;  %v1907_v19 = vmul.f32 %v2697_v17, %v1897_v15 }
0x1551   :  { %v1914_v21 = vsel %vm1910_vm6, %v1908_v13, %v1912_v18  ;;  %v1909_v22 = vsub.f32 1.0, %v1907_v19 }
0x1552   :  { %v1916_v11 = vadd.f32 1.0, %v1914_v21 }
0x1553   :  { %v1913_v23 = vsub.f32 0.0, %v1909_v22 }
0x1554   :  { %v1918_v27 = vmul.f32 %v1916_v11, %v1866_v25 }
0x1555   :  { %v1915_v24 = vsel %vm1911_vm7, %v1909_v22, %v1913_v23 }
0x1556   :  { %v1917_v16 = vadd.f32 1.0, %v1915_v24 }
0x1558   :  { %v1919_v28 = vmul.f32 %v1917_v16, %v1867_v26 }
0x155a   :  { %v1929_v30 = vpack.c.bf16 %v1919_v28, %v1918_v27 }
0x155c   :  { %2525 = vmatmul.mubr.msk.bf16.vlgmr.msra.gmra.mxu0 %vm1252_vm5, %v1929_v30 }
0x161c   :  { %v1991_v31 = vpop.f32.mrf.mxu0 }
0x161d   :  { %v1998_v33 = vadd.f32 %v1991_v31, %v3267_v55 }
0x161e   :  { %v2526_v34 = vpop.f32.mrf.mxu0 }
0x161f   :  { %v2008_v35 = vadd.f32 %v2288_v32, %v1998_v33 }
0x1620   :  { %v1994_v37 = vpop.f32.mrf.mxu0 }
0x1621   :  { %v1999_v38 = vadd.f32 %v1994_v37, %v3272_v2  ;;  %v2012_v36 = vsel %vm616_vm0, %v2008_v35, 0.0 }
0x1622   :  { %2013 = vadd.xlane.f32.xlu1 %v2012_v36  ;;  %v2527_v39 = vpop.f32.mrf.mxu0 }
0x1623   :  { %v2009_v40 = vadd.f32 %v2288_v32, %v1999_v38 }
0x1625   :  { %v2015_v41 = vsel %vm616_vm0, %v2009_v40, 0.0 }
0x1626   :  { %2016 = vadd.xlane.f32.xlu0 %v2015_v41 }
0x16ab   :  { %v2014_v42 = vpop.xlane.xlu1 %2013 }
0x16ac   :  { %v2018_v43 = vmul.f32 0.03125, %v2014_v42 }
0x16ae   :  { %v2020_v44 = vsub.f32 %v2008_v35, %v2018_v43 }
0x16af   :  { %v2017_v45 = vpop.xlane.xlu0 %2016 }
0x16b0   :  { %v2019_v46 = vmul.f32 0.03125, %v2017_v45  ;;  %v2022_v47 = vmul.f32 %v2020_v44, %v2020_v44 }
0x16b2   :  { %v2021_v55 = vsub.f32 %v2009_v40, %v2019_v46  ;;  %v2024_v48 = vsel %vm616_vm0, %v2022_v47, 0.0 }
0x16b3   :  { %2025 = vadd.xlane.f32.xlu1 %v2024_v48 }
0x16b4   :  { %v2023_v49 = vmul.f32 %v2021_v55, %v2021_v55 }
0x16b6   :  { %v2027_v2 = vsel %vm616_vm0, %v2023_v49, 0.0 }
0x16b7   :  { %2028 = vadd.xlane.f32.xlu0 %v2027_v2 }
0x173c   :  { %v2026_v52 = vpop.xlane.xlu1 %2025 }
0x173d   :  { %v2030_v53 = vmul.f32 0.03125, %v2026_v52 }
0x173f   :  { %v2032_v54 = vadd.f32 1e-12, %v2030_v53 }
0x1740   :  { %v2029_v56 = vpop.xlane.xlu0 %2028 }
0x1741   :  { %2698 = vrsqrt.f32 %v2032_v54  ;;  %v2031_v59 = vmul.f32 0.03125, %v2029_v56 }
0x1743   :  { %v2033_v60 = vadd.f32 1e-12, %v2031_v59 }
0x1745   :  { %2700 = vrsqrt.f32 %v2033_v60 }
0x174e   :  { %v2699_v61 = vpop.eup %2698 }
0x174f   :  { %v2036_v1 = vmul.f32 %v2699_v61, %v2020_v44 }
0x1751   :  { %v2044_v3 = vmul.f32 %v2289_v63, %v2036_v1 }
0x1752   :  { %v2701_v14 = vpop.eup %2700 }
0x1753   :  { %v2037_v4 = vmul.f32 %v2701_v14, %v2021_v55  ;;  %v2052_v5 = vadd.f32 %v2290_v29, %v2044_v3 }
0x1755   :  { %v2045_v57 = vmul.f32 %v2289_v63, %v2037_v4  ;;  %v2058_v58 = vpack.c.bf16 %v2052_v5, %v2052_v5 }
0x1757   :  { %v2053_v6 = vadd.f32 %v2290_v29, %v2045_v57  ;;  %v2069_v7 = vunpack.c.l.b16 %v2058_v58 }
0x1759   :  { %v2059_v0 = vpack.c.bf16 %v2053_v6, %v2053_v6 }
0x175b   :  { %v2070_v20 = vunpack.c.l.b16 %v2059_v0 }
0x175d   :  { %v2071_v8 = vrot.slane %v2070_v20, 7 }
0x175f   :  { %v2073_v9 = vsel %vm2072_vm8, %v2071_v8, %v2069_v7 }
0x1760   :  { %v2074_v62 = vpack.c.b16 %v2073_v9, %v2073_v9 }
0x1762   :  { %2533 = vmatmul.mubr.msk.bf16.vlgmr.msra.gmra.mxu1 %vm616_vm0, %v2074_v62 }
0x1822   :  { %v2124_v12 = vpop.f32.mrf.mxu1 }
0x1823   :  { %v2125_v13 = vadd.f32 %v2291_v10, %v2124_v12 }
0x1824   :  { %v2534_v15 = vpop.f32.mrf.mxu1 }
0x1825   :  { %2702 = vtanh.f32 %v2125_v13 }
0x1826   :  { %v2127_v17 = vpop.f32.mrf.mxu1 }
0x1828   :  { %v2535_v18 = vpop.f32.mrf.mxu1 }
0x1832   :  { %v2703_v19 = vpop.eup %2702 }
0x1833   :  { %2132 = vst.msk [vmem:[#allocation2] sm:$0x3] %vm2131_vm9, %v2703_v19 }
0x1834   :  { %2715 = shalt.err (!%p2712_p4)
}
0x1835   :  { %2142 = dma.vmem_to_hbm [thread:$0]  %s2140_s27, 32, %s3365_s20, [#allocation3]  }
0x1836   :  { %2724 = dma.done.wait [#allocation3], 32  }
0x1837   :  { %2725 = vsyncadd [#allocation3], 4294967264 }
0x1838   :  { %2146 = vsyncpa [#allocation3], 1 }

</bundles_post_ra>
